<compile_context>
chip_gen: v7x
topology: tpu7x:2x2x1
jax: 0.10.0
libtpu: 0.0.40
codegen_flags: <defaults>
</compile_context>

<pallas_src>
import math

import jax
import jax.numpy as jnp
from jax import lax
from jax.experimental import pallas as pl
from jax.experimental.pallas import tpu as pltpu

# ---- model hyper-parameters (small, synthetic) ------------------------------
S = 8            # sequence length
B = 2            # batch
E = 32           # d_model
NHEAD = 4
DH = E // NHEAD  # head dim
DFF = 64         # feed-forward hidden dim
NUM_LAYERS = 2
LN_EPS = 1e-5
BS = B * S       # folded (batch * seq) rows
NEG_INF = -1e9

# ---- packed per-layer parameter slab layout: (40, 256) f32 ------------------
# rows 0..E-1 (32 rows): weight matrices, lane-concatenated:
#   [  0: 96) Win^T  (E, 3E)  -- 1/sqrt(DH) folded into the Q columns
#   [ 96:128) Wout^T (E, E)
#   [128:192) W1^T   (E, DFF)
#   [192:256) W2     (E, DFF) -- untransposed, contracted A@B^T style
# rows 32..39: bias / LayerNorm vectors (one per row)
SLAB_ROWS = 40
SLAB_LANES = 256
COL_WIN, COL_WOUT, COL_W1, COL_W2 = 0, 96, 128, 192
ROW_IN_B, ROW_OUT_B, ROW_B1, ROW_B2, ROW_G1, ROW_BE1, ROW_G2, ROW_BE2 = range(32, 40)


# ---- Pallas kernel: whole encoder stack in one invocation -------------------
def _encoder_kernel(x_ref, mask_ref, params_ref, o_ref):
    x = x_ref[...].astype(jnp.float32)        # (BS, E) activations, both batches
    mask = mask_ref[...]                      # (BS, BS) additive (batch-block + padding)

    num_layers = params_ref.shape[0]
    for l in range(num_layers):               # small static unroll over layers
        slab = params_ref[l]                  # (40, 256) packed weights + biases
        win = slab[0:E, COL_WIN:COL_WIN + 3 * E]       # (E, 3E)
        wout = slab[0:E, COL_WOUT:COL_WOUT + E]        # (E, E)
        w1 = slab[0:E, COL_W1:COL_W1 + DFF]            # (E, DFF)
        w2 = slab[0:E, COL_W2:COL_W2 + DFF]            # (E, DFF) untransposed
        in_b = slab[ROW_IN_B:ROW_IN_B + 1, 0:3 * E]
        out_b = slab[ROW_OUT_B:ROW_OUT_B + 1, 0:E]
        b1 = slab[ROW_B1:ROW_B1 + 1, 0:DFF]
        b2 = slab[ROW_B2:ROW_B2 + 1, 0:E]
        g1 = slab[ROW_G1:ROW_G1 + 1, 0:E]
        be1 = slab[ROW_BE1:ROW_BE1 + 1, 0:E]
        g2 = slab[ROW_G2:ROW_G2 + 1, 0:E]
        be2 = slab[ROW_BE2:ROW_BE2 + 1, 0:E]

        # --- multi-head self-attention, batch folded into the rows -----------
        # (1/sqrt(DH) already folded into the Q columns of win / in_b)
        qkv = jnp.dot(x, win, preferred_element_type=jnp.float32) + in_b      # (BS, 3E)
        ctx_heads = []
        for h in range(NHEAD):                 # 2 MXU pushes per head
            lo = h * DH
            qh = qkv[:, lo:lo + DH]                                           # (BS, DH)
            kh = qkv[:, E + lo:E + lo + DH]
            vh = qkv[:, 2 * E + lo:2 * E + lo + DH]
            # scores for BOTH batches at once (A @ B^T form, no transpose op);
            # the additive mask kills the cross-batch blocks and padded keys.
            sc = lax.dot_general(qh, kh, (((1,), (1,)), ((), ())),
                                 preferred_element_type=jnp.float32)          # (BS, BS)
            sc = sc + mask
            sc = sc - jnp.max(sc, axis=-1, keepdims=True)
            p = jnp.exp(sc)
            p = p * pl.reciprocal(jnp.sum(p, axis=-1, keepdims=True), approx=True)
            ctx_heads.append(jnp.dot(p, vh, preferred_element_type=jnp.float32))
        ctx = jnp.concatenate(ctx_heads, axis=-1)                             # (BS, E)
        attn = jnp.dot(ctx, wout, preferred_element_type=jnp.float32) + out_b

        # --- residual + LayerNorm 1 ---
        x1 = x + attn
        mu = jnp.mean(x1, axis=-1, keepdims=True)
        var = jnp.mean((x1 - mu) ** 2, axis=-1, keepdims=True)
        x1 = (x1 - mu) * lax.rsqrt(var + LN_EPS) * g1 + be1

        # --- feed-forward (ReLU) ---
        hdn = jnp.maximum(jnp.dot(x1, w1, preferred_element_type=jnp.float32) + b1, 0.0)
        ff = lax.dot_general(hdn, w2, (((1,), (1,)), ((), ())),
                             preferred_element_type=jnp.float32) + b2         # h @ W2^T

        # --- residual + LayerNorm 2 ---
        x2 = x1 + ff
        mu2 = jnp.mean(x2, axis=-1, keepdims=True)
        var2 = jnp.mean((x2 - mu2) ** 2, axis=-1, keepdims=True)
        x = (x2 - mu2) * lax.rsqrt(var2 + LN_EPS) * g2 + be2

    o_ref[...] = x.astype(o_ref.dtype)


# ---- parameter packing (runs once in the wrapper, plain XLA) ----------------
def _pack_layer_params(params):
    (in_w, in_b, out_w, out_b, w1, b1, w2, b2, g1, be1, g2, be2) = params
    scale = 1.0 / math.sqrt(DH)
    # pre-transpose + fold attention scale into the Q part of the in-projection
    win_t = jnp.concatenate([in_w[:E].T * scale, in_w[E:].T], axis=1)         # (E, 3E)
    in_b_s = jnp.concatenate([in_b[:, :E] * scale, in_b[:, E:]], axis=1)      # (1, 3E)

    slab = jnp.zeros((SLAB_ROWS, SLAB_LANES), jnp.float32)
    slab = slab.at[0:E, COL_WIN:COL_WIN + 3 * E].set(win_t)
    slab = slab.at[0:E, COL_WOUT:COL_WOUT + E].set(out_w.T)
    slab = slab.at[0:E, COL_W1:COL_W1 + DFF].set(w1.T)
    slab = slab.at[0:E, COL_W2:COL_W2 + DFF].set(w2)          # keep (E, DFF)
    slab = slab.at[ROW_IN_B, 0:3 * E].set(in_b_s[0])
    slab = slab.at[ROW_OUT_B, 0:E].set(out_b[0])
    slab = slab.at[ROW_B1, 0:DFF].set(b1[0])
    slab = slab.at[ROW_B2, 0:E].set(b2[0])
    slab = slab.at[ROW_G1, 0:E].set(g1[0])
    slab = slab.at[ROW_BE1, 0:E].set(be1[0])
    slab = slab.at[ROW_G2, 0:E].set(g2[0])
    slab = slab.at[ROW_BE2, 0:E].set(be2[0])
    return slab


def transformer_encoder_pallas(src_sbe, add_mask, layer_params):
    """Fused TransformerEncoder forward. src_sbe: (S,B,E); add_mask: (B,S) additive."""
    num_layers = len(layer_params)

    # fold batch into the rows: (S,B,E) -> (B*S, E)
    x_flat = jnp.transpose(src_sbe, (1, 0, 2)).reshape(BS, E)

    # block-diagonal additive mask: keeps batches from attending to each other
    # and applies the key-padding mask, all in one (BS, BS) tile.
    batch_of_row = jnp.arange(BS, dtype=jnp.int32) // S
    same_batch = batch_of_row[:, None] == batch_of_row[None, :]
    mask_full = jnp.where(same_batch, add_mask.reshape(-1)[None, :],
                          jnp.float32(NEG_INF)).astype(jnp.float32)           # (BS, BS)

    slabs = jnp.stack([_pack_layer_params(p) for p in layer_params])          # (L, 40, 256)

    out_flat = pl.pallas_call(
        _encoder_kernel,
        out_shape=jax.ShapeDtypeStruct((BS, E), jnp.float32),
        grid_spec=pltpu.PrefetchScalarGridSpec(
            num_scalar_prefetch=0,
            grid=(1,),                                   # single fused step
            in_specs=[
                pl.BlockSpec((BS, E), lambda i: (0, 0)),                       # activations
                pl.BlockSpec((BS, BS), lambda i: (0, 0)),                      # block mask
                pl.BlockSpec((num_layers, SLAB_ROWS, SLAB_LANES),
                             lambda i: (0, 0, 0)),                             # all params
            ],
            out_specs=pl.BlockSpec((BS, E), lambda i: (0, 0)),
        ),
        compiler_params=pltpu.CompilerParams(
            dimension_semantics=("arbitrary",)),
    )(x_flat, mask_full, slabs)

    return jnp.transpose(out_flat.reshape(B, S, E), (1, 0, 2))                 # back to (S,B,E)


# ---- pure-JAX reference (for correctness check) -----------------------------
def _layernorm(x, g, b):
    mu = jnp.mean(x, axis=-1, keepdims=True)
    var = jnp.mean((x - mu) ** 2, axis=-1, keepdims=True)
    return (x - mu) * lax.rsqrt(var + LN_EPS) * g + b


def encoder_layer_ref(x, add_mask, params):
    (in_w, in_b, out_w, out_b, w1, b1, w2, b2, g1, be1, g2, be2) = params
    qkv = jnp.einsum('sbe,fe->sbf', x, in_w) + in_b[0]
    q, k, v = qkv[..., :E], qkv[..., E:2 * E], qkv[..., 2 * E:]

    def to_heads(t):   # (S,B,E) -> (B,H,S,DH)
        return t.reshape(S, B, NHEAD, DH).transpose(1, 2, 0, 3)

    qh, kh, vh = to_heads(q), to_heads(k), to_heads(v)
    sc = jnp.einsum('bhqd,bhkd->bhqk', qh, kh) / math.sqrt(DH)
    sc = sc + add_mask[:, None, None, :]
    p = jax.nn.softmax(sc, axis=-1)
    a = jnp.einsum('bhqk,bhkd->bhqd', p, vh)
    a = a.transpose(2, 0, 1, 3).reshape(S, B, E)
    a = jnp.einsum('sbe,fe->sbf', a, out_w) + out_b[0]
    x1 = _layernorm(x + a, g1[0], be1[0])
    h = jnp.maximum(jnp.einsum('sbe,fe->sbf', x1, w1) + b1[0], 0.0)
    ff = jnp.einsum('sbf,ef->sbe', h, w2) + b2[0]
    return _layernorm(x1 + ff, g2[0], be2[0])


def transformer_encoder_ref(src, add_mask, layer_params):
    out = src
    for params in layer_params:
        out = encoder_layer_ref(out, add_mask, params)
    return out


# ---- deterministic parameter init -------------------------------------------
def init_layer_params(key):
    ks = jax.random.split(key, 8)

    def u(k, shape, fan_in):
        bound = 1.0 / math.sqrt(fan_in)
        return jax.random.uniform(k, shape, jnp.float32, -bound, bound)

    in_w = u(ks[0], (3 * E, E), E)
    in_b = u(ks[1], (1, 3 * E), E)
    out_w = u(ks[2], (E, E), E)
    out_b = u(ks[3], (1, E), E)
    w1 = u(ks[4], (DFF, E), E)
    b1 = u(ks[5], (1, DFF), E)
    w2 = u(ks[6], (E, DFF), DFF)
    b2 = u(ks[7], (1, E), DFF)
    g1 = jnp.ones((1, E), jnp.float32)
    be1 = jnp.zeros((1, E), jnp.float32)
    g2 = jnp.ones((1, E), jnp.float32)
    be2 = jnp.zeros((1, E), jnp.float32)
    return (in_w, in_b, out_w, out_b, w1, b1, w2, b2, g1, be1, g2, be2)


if __name__ == "__main__":
    root = jax.random.PRNGKey(0)
    k_x, *k_layers = jax.random.split(root, 1 + NUM_LAYERS)

    # source sequence, seq-first (S, B, E) like PyTorch default (batch_first=False)
    src = jax.random.normal(k_x, (S, B, E), dtype=jnp.float32)

    # key padding mask: True = padded position (PyTorch semantics) -> additive mask
    # NOTE: a fully-padded row would give uniform attention here vs NaN in PyTorch
    # (edge case not exercised by this mask).
    key_padding_mask = jnp.zeros((B, S), dtype=bool).at[1, S - 2:].set(True)
    add_mask = jnp.where(key_padding_mask, NEG_INF, 0.0).astype(jnp.float32)

    layer_params = [init_layer_params(k) for k in k_layers]

    fwd = jax.jit(transformer_encoder_pallas)
    out = jax.block_until_ready(fwd(src, add_mask, layer_params))

    ref = transformer_encoder_ref(src, add_mask, layer_params)
    assert out.shape == (S, B, E)
    # approx reciprocal in the softmax -> slightly looser (still tight) tolerance
    assert jnp.allclose(out, ref, rtol=2e-3, atol=2e-3), "mismatch vs reference"

    print("KERNEL_OK")
</pallas_src>

<mosaic_0001>
module attributes {stable_mosaic.version = 11 : i64} {
  func.func @_encoder_kernel(%arg0: i32, %arg1: memref<16x32xf32, #tpu.memory_space<vmem>>, %arg2: memref<16x16xf32, #tpu.memory_space<vmem>>, %arg3: memref<2x40x256xf32, #tpu.memory_space<vmem>>, %arg4: memref<16x32xf32, #tpu.memory_space<vmem>>) attributes {dimension_semantics = [#tpu.dimension_semantics<arbitrary>], iteration_bounds = array<i64: 1>, scalar_prefetch = 0 : i64, scratch_operands = 0 : i64, tpu.core_type = #tpu.core_type<tc>, window_params = [{pipeline_mode = #tpu.pipeline_mode<synchronous>, transform_indices = @transform_0, window_bounds = array<i64: 16, 32>}, {pipeline_mode = #tpu.pipeline_mode<synchronous>, transform_indices = @transform_1, window_bounds = array<i64: 16, 16>}, {pipeline_mode = #tpu.pipeline_mode<synchronous>, transform_indices = @transform_2, window_bounds = array<i64: 2, 40, 256>}, {pipeline_mode = #tpu.pipeline_mode<synchronous>, transform_indices = @transform_3, window_bounds = array<i64: 16, 32>}]} {
    %c0 = arith.constant 0 : index
    %c0_0 = arith.constant 0 : index
    %0 = vector.load %arg1[%c0, %c0_0] : memref<16x32xf32, #tpu.memory_space<vmem>>, vector<16x32xf32>
    %c0_1 = arith.constant 0 : index
    %c0_2 = arith.constant 0 : index
    %1 = vector.load %arg2[%c0_1, %c0_2] : memref<16x16xf32, #tpu.memory_space<vmem>>, vector<16x16xf32>
    %c0_3 = arith.constant 0 : index
    %c0_4 = arith.constant 0 : index
    %c0_5 = arith.constant 0 : index
    %2 = vector.load %arg3[%c0_3, %c0_4, %c0_5] : memref<2x40x256xf32, #tpu.memory_space<vmem>>, vector<1x40x256xf32>
    %3 = vector.shape_cast %2 : vector<1x40x256xf32> to vector<40x256xf32>
    %4 = vector.extract_strided_slice %3 {offsets = [0, 0], sizes = [32, 96], strides = [1, 1]} : vector<40x256xf32> to vector<32x96xf32>
    %5 = vector.extract_strided_slice %3 {offsets = [0, 96], sizes = [32, 32], strides = [1, 1]} : vector<40x256xf32> to vector<32x32xf32>
    %6 = vector.extract_strided_slice %3 {offsets = [0, 128], sizes = [32, 64], strides = [1, 1]} : vector<40x256xf32> to vector<32x64xf32>
    %7 = vector.extract_strided_slice %3 {offsets = [0, 192], sizes = [32, 64], strides = [1, 1]} : vector<40x256xf32> to vector<32x64xf32>
    %8 = vector.extract_strided_slice %3 {offsets = [32, 0], sizes = [1, 96], strides = [1, 1]} : vector<40x256xf32> to vector<1x96xf32>
    %9 = vector.extract_strided_slice %3 {offsets = [33, 0], sizes = [1, 32], strides = [1, 1]} : vector<40x256xf32> to vector<1x32xf32>
    %10 = vector.extract_strided_slice %3 {offsets = [34, 0], sizes = [1, 64], strides = [1, 1]} : vector<40x256xf32> to vector<1x64xf32>
    %11 = vector.extract_strided_slice %3 {offsets = [35, 0], sizes = [1, 32], strides = [1, 1]} : vector<40x256xf32> to vector<1x32xf32>
    %12 = vector.extract_strided_slice %3 {offsets = [36, 0], sizes = [1, 32], strides = [1, 1]} : vector<40x256xf32> to vector<1x32xf32>
    %13 = vector.extract_strided_slice %3 {offsets = [37, 0], sizes = [1, 32], strides = [1, 1]} : vector<40x256xf32> to vector<1x32xf32>
    %14 = vector.extract_strided_slice %3 {offsets = [38, 0], sizes = [1, 32], strides = [1, 1]} : vector<40x256xf32> to vector<1x32xf32>
    %15 = vector.extract_strided_slice %3 {offsets = [39, 0], sizes = [1, 32], strides = [1, 1]} : vector<40x256xf32> to vector<1x32xf32>
    %cst = arith.constant dense<0.000000e+00> : vector<16x96xf32>
    %16 = tpu.matmul %0, %4, %cst {dimension_numbers = #tpu.dot_dimension_numbers<[1], [0], [0], [1], [0, 0, 1, 1], [], []>} : vector<16x32xf32>, vector<32x96xf32>, vector<16x96xf32> -> vector<16x96xf32>
    %17 = vector.broadcast %8 : vector<1x96xf32> to vector<16x96xf32>
    %18 = arith.addf %16, %17 : vector<16x96xf32>
    %19 = vector.extract_strided_slice %18 {offsets = [0, 0], sizes = [16, 8], strides = [1, 1]} : vector<16x96xf32> to vector<16x8xf32>
    %20 = vector.extract_strided_slice %18 {offsets = [0, 32], sizes = [16, 8], strides = [1, 1]} : vector<16x96xf32> to vector<16x8xf32>
    %21 = vector.extract_strided_slice %18 {offsets = [0, 64], sizes = [16, 8], strides = [1, 1]} : vector<16x96xf32> to vector<16x8xf32>
    %cst_6 = arith.constant dense<0.000000e+00> : vector<16x16xf32>
    %22 = tpu.matmul %19, %20, %cst_6 {dimension_numbers = #tpu.dot_dimension_numbers<[1], [1], [0], [0], [0, 0, 1, 0], [], []>} : vector<16x8xf32>, vector<16x8xf32>, vector<16x16xf32> -> vector<16x16xf32>
    %23 = arith.addf %22, %1 : vector<16x16xf32>
    %cst_7 = arith.constant dense<0xFF800000> : vector<16xf32>
    %24 = vector.multi_reduction <maximumf>, %23, %cst_7 [1] : vector<16x16xf32> to vector<16xf32>
    %25 = vector.shape_cast %24 : vector<16xf32> to vector<16x1xf32>
    %26 = vector.broadcast %25 : vector<16x1xf32> to vector<16x16xf32>
    %27 = arith.subf %23, %26 : vector<16x16xf32>
    %28 = math.exp %27 : vector<16x16xf32>
    %cst_8 = arith.constant dense<0.000000e+00> : vector<16xf32>
    %29 = vector.multi_reduction <add>, %28, %cst_8 [1] : vector<16x16xf32> to vector<16xf32>
    %30 = vector.shape_cast %29 : vector<16xf32> to vector<16x1xf32>
    %31 = tpu.reciprocal %30 {approx = true} : vector<16x1xf32> -> vector<16x1xf32>
    %32 = vector.broadcast %31 : vector<16x1xf32> to vector<16x16xf32>
    %33 = arith.mulf %28, %32 : vector<16x16xf32>
    %cst_9 = arith.constant dense<0.000000e+00> : vector<16x8xf32>
    %34 = tpu.matmul %33, %21, %cst_9 {dimension_numbers = #tpu.dot_dimension_numbers<[1], [0], [0], [1], [0, 0, 1, 1], [], []>} : vector<16x16xf32>, vector<16x8xf32>, vector<16x8xf32> -> vector<16x8xf32>
    %35 = vector.extract_strided_slice %18 {offsets = [0, 8], sizes = [16, 8], strides = [1, 1]} : vector<16x96xf32> to vector<16x8xf32>
    %36 = vector.extract_strided_slice %18 {offsets = [0, 40], sizes = [16, 8], strides = [1, 1]} : vector<16x96xf32> to vector<16x8xf32>
    %37 = vector.extract_strided_slice %18 {offsets = [0, 72], sizes = [16, 8], strides = [1, 1]} : vector<16x96xf32> to vector<16x8xf32>
    %cst_10 = arith.constant dense<0.000000e+00> : vector<16x16xf32>
    %38 = tpu.matmul %35, %36, %cst_10 {dimension_numbers = #tpu.dot_dimension_numbers<[1], [1], [0], [0], [0, 0, 1, 0], [], []>} : vector<16x8xf32>, vector<16x8xf32>, vector<16x16xf32> -> vector<16x16xf32>
    %39 = arith.addf %38, %1 : vector<16x16xf32>
    %cst_11 = arith.constant dense<0xFF800000> : vector<16xf32>
    %40 = vector.multi_reduction <maximumf>, %39, %cst_11 [1] : vector<16x16xf32> to vector<16xf32>
    %41 = vector.shape_cast %40 : vector<16xf32> to vector<16x1xf32>
    %42 = vector.broadcast %41 : vector<16x1xf32> to vector<16x16xf32>
    %43 = arith.subf %39, %42 : vector<16x16xf32>
    %44 = math.exp %43 : vector<16x16xf32>
    %cst_12 = arith.constant dense<0.000000e+00> : vector<16xf32>
    %45 = vector.multi_reduction <add>, %44, %cst_12 [1] : vector<16x16xf32> to vector<16xf32>
    %46 = vector.shape_cast %45 : vector<16xf32> to vector<16x1xf32>
    %47 = tpu.reciprocal %46 {approx = true} : vector<16x1xf32> -> vector<16x1xf32>
    %48 = vector.broadcast %47 : vector<16x1xf32> to vector<16x16xf32>
    %49 = arith.mulf %44, %48 : vector<16x16xf32>
    %cst_13 = arith.constant dense<0.000000e+00> : vector<16x8xf32>
    %50 = tpu.matmul %49, %37, %cst_13 {dimension_numbers = #tpu.dot_dimension_numbers<[1], [0], [0], [1], [0, 0, 1, 1], [], []>} : vector<16x16xf32>, vector<16x8xf32>, vector<16x8xf32> -> vector<16x8xf32>
    %51 = vector.extract_strided_slice %18 {offsets = [0, 16], sizes = [16, 8], strides = [1, 1]} : vector<16x96xf32> to vector<16x8xf32>
    %52 = vector.extract_strided_slice %18 {offsets = [0, 48], sizes = [16, 8], strides = [1, 1]} : vector<16x96xf32> to vector<16x8xf32>
    %53 = vector.extract_strided_slice %18 {offsets = [0, 80], sizes = [16, 8], strides = [1, 1]} : vector<16x96xf32> to vector<16x8xf32>
    %cst_14 = arith.constant dense<0.000000e+00> : vector<16x16xf32>
    %54 = tpu.matmul %51, %52, %cst_14 {dimension_numbers = #tpu.dot_dimension_numbers<[1], [1], [0], [0], [0, 0, 1, 0], [], []>} : vector<16x8xf32>, vector<16x8xf32>, vector<16x16xf32> -> vector<16x16xf32>
    %55 = arith.addf %54, %1 : vector<16x16xf32>
    %cst_15 = arith.constant dense<0xFF800000> : vector<16xf32>
    %56 = vector.multi_reduction <maximumf>, %55, %cst_15 [1] : vector<16x16xf32> to vector<16xf32>
    %57 = vector.shape_cast %56 : vector<16xf32> to vector<16x1xf32>
    %58 = vector.broadcast %57 : vector<16x1xf32> to vector<16x16xf32>
    %59 = arith.subf %55, %58 : vector<16x16xf32>
    %60 = math.exp %59 : vector<16x16xf32>
    %cst_16 = arith.constant dense<0.000000e+00> : vector<16xf32>
    %61 = vector.multi_reduction <add>, %60, %cst_16 [1] : vector<16x16xf32> to vector<16xf32>
    %62 = vector.shape_cast %61 : vector<16xf32> to vector<16x1xf32>
    %63 = tpu.reciprocal %62 {approx = true} : vector<16x1xf32> -> vector<16x1xf32>
    %64 = vector.broadcast %63 : vector<16x1xf32> to vector<16x16xf32>
    %65 = arith.mulf %60, %64 : vector<16x16xf32>
    %cst_17 = arith.constant dense<0.000000e+00> : vector<16x8xf32>
    %66 = tpu.matmul %65, %53, %cst_17 {dimension_numbers = #tpu.dot_dimension_numbers<[1], [0], [0], [1], [0, 0, 1, 1], [], []>} : vector<16x16xf32>, vector<16x8xf32>, vector<16x8xf32> -> vector<16x8xf32>
    %67 = vector.extract_strided_slice %18 {offsets = [0, 24], sizes = [16, 8], strides = [1, 1]} : vector<16x96xf32> to vector<16x8xf32>
    %68 = vector.extract_strided_slice %18 {offsets = [0, 56], sizes = [16, 8], strides = [1, 1]} : vector<16x96xf32> to vector<16x8xf32>
    %69 = vector.extract_strided_slice %18 {offsets = [0, 88], sizes = [16, 8], strides = [1, 1]} : vector<16x96xf32> to vector<16x8xf32>
    %cst_18 = arith.constant dense<0.000000e+00> : vector<16x16xf32>
    %70 = tpu.matmul %67, %68, %cst_18 {dimension_numbers = #tpu.dot_dimension_numbers<[1], [1], [0], [0], [0, 0, 1, 0], [], []>} : vector<16x8xf32>, vector<16x8xf32>, vector<16x16xf32> -> vector<16x16xf32>
    %71 = arith.addf %70, %1 : vector<16x16xf32>
    %cst_19 = arith.constant dense<0xFF800000> : vector<16xf32>
    %72 = vector.multi_reduction <maximumf>, %71, %cst_19 [1] : vector<16x16xf32> to vector<16xf32>
    %73 = vector.shape_cast %72 : vector<16xf32> to vector<16x1xf32>
    %74 = vector.broadcast %73 : vector<16x1xf32> to vector<16x16xf32>
    %75 = arith.subf %71, %74 : vector<16x16xf32>
    %76 = math.exp %75 : vector<16x16xf32>
    %cst_20 = arith.constant dense<0.000000e+00> : vector<16xf32>
    %77 = vector.multi_reduction <add>, %76, %cst_20 [1] : vector<16x16xf32> to vector<16xf32>
    %78 = vector.shape_cast %77 : vector<16xf32> to vector<16x1xf32>
    %79 = tpu.reciprocal %78 {approx = true} : vector<16x1xf32> -> vector<16x1xf32>
    %80 = vector.broadcast %79 : vector<16x1xf32> to vector<16x16xf32>
    %81 = arith.mulf %76, %80 : vector<16x16xf32>
    %cst_21 = arith.constant dense<0.000000e+00> : vector<16x8xf32>
    %82 = tpu.matmul %81, %69, %cst_21 {dimension_numbers = #tpu.dot_dimension_numbers<[1], [0], [0], [1], [0, 0, 1, 1], [], []>} : vector<16x16xf32>, vector<16x8xf32>, vector<16x8xf32> -> vector<16x8xf32>
    %83 = tpu.concatenate %34, %50, %66, %82 in 1 : vector<16x8xf32>, vector<16x8xf32>, vector<16x8xf32>, vector<16x8xf32> -> vector<16x32xf32>
    %cst_22 = arith.constant dense<0.000000e+00> : vector<16x32xf32>
    %84 = tpu.matmul %83, %5, %cst_22 {dimension_numbers = #tpu.dot_dimension_numbers<[1], [0], [0], [1], [0, 0, 1, 1], [], []>} : vector<16x32xf32>, vector<32x32xf32>, vector<16x32xf32> -> vector<16x32xf32>
    %85 = vector.broadcast %9 : vector<1x32xf32> to vector<16x32xf32>
    %86 = arith.addf %84, %85 : vector<16x32xf32>
    %87 = arith.addf %0, %86 : vector<16x32xf32>
    %cst_23 = arith.constant dense<0.000000e+00> : vector<16xf32>
    %88 = vector.multi_reduction <add>, %87, %cst_23 [1] : vector<16x32xf32> to vector<16xf32>
    %89 = vector.shape_cast %88 : vector<16xf32> to vector<16x1xf32>
    %cst_24 = arith.constant 3.200000e+01 : f32
    %90 = vector.broadcast %cst_24 : f32 to vector<16x1xf32>
    %91 = arith.divf %89, %90 : vector<16x1xf32>
    %92 = vector.broadcast %91 : vector<16x1xf32> to vector<16x32xf32>
    %93 = arith.subf %87, %92 : vector<16x32xf32>
    %94 = arith.mulf %93, %93 : vector<16x32xf32>
    %cst_25 = arith.constant dense<0.000000e+00> : vector<16xf32>
    %95 = vector.multi_reduction <add>, %94, %cst_25 [1] : vector<16x32xf32> to vector<16xf32>
    %96 = vector.shape_cast %95 : vector<16xf32> to vector<16x1xf32>
    %cst_26 = arith.constant 3.200000e+01 : f32
    %97 = vector.broadcast %cst_26 : f32 to vector<16x1xf32>
    %98 = arith.divf %96, %97 : vector<16x1xf32>
    %99 = vector.broadcast %91 : vector<16x1xf32> to vector<16x32xf32>
    %100 = arith.subf %87, %99 : vector<16x32xf32>
    %cst_27 = arith.constant 9.99999974E-6 : f32
    %101 = vector.broadcast %cst_27 : f32 to vector<16x1xf32>
    %102 = arith.addf %98, %101 : vector<16x1xf32>
    %103 = math.rsqrt %102 : vector<16x1xf32>
    %104 = vector.broadcast %103 : vector<16x1xf32> to vector<16x32xf32>
    %105 = arith.mulf %100, %104 : vector<16x32xf32>
    %106 = vector.broadcast %12 : vector<1x32xf32> to vector<16x32xf32>
    %107 = arith.mulf %105, %106 : vector<16x32xf32>
    %108 = vector.broadcast %13 : vector<1x32xf32> to vector<16x32xf32>
    %109 = arith.addf %107, %108 : vector<16x32xf32>
    %cst_28 = arith.constant dense<0.000000e+00> : vector<16x64xf32>
    %110 = tpu.matmul %109, %6, %cst_28 {dimension_numbers = #tpu.dot_dimension_numbers<[1], [0], [0], [1], [0, 0, 1, 1], [], []>} : vector<16x32xf32>, vector<32x64xf32>, vector<16x64xf32> -> vector<16x64xf32>
    %111 = vector.broadcast %10 : vector<1x64xf32> to vector<16x64xf32>
    %112 = arith.addf %110, %111 : vector<16x64xf32>
    %cst_29 = arith.constant 0.000000e+00 : f32
    %113 = vector.broadcast %cst_29 : f32 to vector<16x64xf32>
    %114 = arith.maximumf %112, %113 : vector<16x64xf32>
    %cst_30 = arith.constant dense<0.000000e+00> : vector<16x32xf32>
    %115 = tpu.matmul %114, %7, %cst_30 {dimension_numbers = #tpu.dot_dimension_numbers<[1], [1], [0], [0], [0, 0, 1, 0], [], []>} : vector<16x64xf32>, vector<32x64xf32>, vector<16x32xf32> -> vector<16x32xf32>
    %116 = vector.broadcast %11 : vector<1x32xf32> to vector<16x32xf32>
    %117 = arith.addf %115, %116 : vector<16x32xf32>
    %118 = arith.addf %109, %117 : vector<16x32xf32>
    %cst_31 = arith.constant dense<0.000000e+00> : vector<16xf32>
    %119 = vector.multi_reduction <add>, %118, %cst_31 [1] : vector<16x32xf32> to vector<16xf32>
    %120 = vector.shape_cast %119 : vector<16xf32> to vector<16x1xf32>
    %cst_32 = arith.constant 3.200000e+01 : f32
    %121 = vector.broadcast %cst_32 : f32 to vector<16x1xf32>
    %122 = arith.divf %120, %121 : vector<16x1xf32>
    %123 = vector.broadcast %122 : vector<16x1xf32> to vector<16x32xf32>
    %124 = arith.subf %118, %123 : vector<16x32xf32>
    %125 = arith.mulf %124, %124 : vector<16x32xf32>
    %cst_33 = arith.constant dense<0.000000e+00> : vector<16xf32>
    %126 = vector.multi_reduction <add>, %125, %cst_33 [1] : vector<16x32xf32> to vector<16xf32>
    %127 = vector.shape_cast %126 : vector<16xf32> to vector<16x1xf32>
    %cst_34 = arith.constant 3.200000e+01 : f32
    %128 = vector.broadcast %cst_34 : f32 to vector<16x1xf32>
    %129 = arith.divf %127, %128 : vector<16x1xf32>
    %130 = vector.broadcast %122 : vector<16x1xf32> to vector<16x32xf32>
    %131 = arith.subf %118, %130 : vector<16x32xf32>
    %cst_35 = arith.constant 9.99999974E-6 : f32
    %132 = vector.broadcast %cst_35 : f32 to vector<16x1xf32>
    %133 = arith.addf %129, %132 : vector<16x1xf32>
    %134 = math.rsqrt %133 : vector<16x1xf32>
    %135 = vector.broadcast %134 : vector<16x1xf32> to vector<16x32xf32>
    %136 = arith.mulf %131, %135 : vector<16x32xf32>
    %137 = vector.broadcast %14 : vector<1x32xf32> to vector<16x32xf32>
    %138 = arith.mulf %136, %137 : vector<16x32xf32>
    %139 = vector.broadcast %15 : vector<1x32xf32> to vector<16x32xf32>
    %140 = arith.addf %138, %139 : vector<16x32xf32>
    %c1 = arith.constant 1 : index
    %c0_36 = arith.constant 0 : index
    %c0_37 = arith.constant 0 : index
    %141 = vector.load %arg3[%c1, %c0_36, %c0_37] : memref<2x40x256xf32, #tpu.memory_space<vmem>>, vector<1x40x256xf32>
    %142 = vector.shape_cast %141 : vector<1x40x256xf32> to vector<40x256xf32>
    %143 = vector.extract_strided_slice %142 {offsets = [0, 0], sizes = [32, 96], strides = [1, 1]} : vector<40x256xf32> to vector<32x96xf32>
    %144 = vector.extract_strided_slice %142 {offsets = [0, 96], sizes = [32, 32], strides = [1, 1]} : vector<40x256xf32> to vector<32x32xf32>
    %145 = vector.extract_strided_slice %142 {offsets = [0, 128], sizes = [32, 64], strides = [1, 1]} : vector<40x256xf32> to vector<32x64xf32>
    %146 = vector.extract_strided_slice %142 {offsets = [0, 192], sizes = [32, 64], strides = [1, 1]} : vector<40x256xf32> to vector<32x64xf32>
    %147 = vector.extract_strided_slice %142 {offsets = [32, 0], sizes = [1, 96], strides = [1, 1]} : vector<40x256xf32> to vector<1x96xf32>
    %148 = vector.extract_strided_slice %142 {offsets = [33, 0], sizes = [1, 32], strides = [1, 1]} : vector<40x256xf32> to vector<1x32xf32>
    %149 = vector.extract_strided_slice %142 {offsets = [34, 0], sizes = [1, 64], strides = [1, 1]} : vector<40x256xf32> to vector<1x64xf32>
    %150 = vector.extract_strided_slice %142 {offsets = [35, 0], sizes = [1, 32], strides = [1, 1]} : vector<40x256xf32> to vector<1x32xf32>
    %151 = vector.extract_strided_slice %142 {offsets = [36, 0], sizes = [1, 32], strides = [1, 1]} : vector<40x256xf32> to vector<1x32xf32>
    %152 = vector.extract_strided_slice %142 {offsets = [37, 0], sizes = [1, 32], strides = [1, 1]} : vector<40x256xf32> to vector<1x32xf32>
    %153 = vector.extract_strided_slice %142 {offsets = [38, 0], sizes = [1, 32], strides = [1, 1]} : vector<40x256xf32> to vector<1x32xf32>
    %154 = vector.extract_strided_slice %142 {offsets = [39, 0], sizes = [1, 32], strides = [1, 1]} : vector<40x256xf32> to vector<1x32xf32>
    %cst_38 = arith.constant dense<0.000000e+00> : vector<16x96xf32>
    %155 = tpu.matmul %140, %143, %cst_38 {dimension_numbers = #tpu.dot_dimension_numbers<[1], [0], [0], [1], [0, 0, 1, 1], [], []>} : vector<16x32xf32>, vector<32x96xf32>, vector<16x96xf32> -> vector<16x96xf32>
    %156 = vector.broadcast %147 : vector<1x96xf32> to vector<16x96xf32>
    %157 = arith.addf %155, %156 : vector<16x96xf32>
    %158 = vector.extract_strided_slice %157 {offsets = [0, 0], sizes = [16, 8], strides = [1, 1]} : vector<16x96xf32> to vector<16x8xf32>
    %159 = vector.extract_strided_slice %157 {offsets = [0, 32], sizes = [16, 8], strides = [1, 1]} : vector<16x96xf32> to vector<16x8xf32>
    %160 = vector.extract_strided_slice %157 {offsets = [0, 64], sizes = [16, 8], strides = [1, 1]} : vector<16x96xf32> to vector<16x8xf32>
    %cst_39 = arith.constant dense<0.000000e+00> : vector<16x16xf32>
    %161 = tpu.matmul %158, %159, %cst_39 {dimension_numbers = #tpu.dot_dimension_numbers<[1], [1], [0], [0], [0, 0, 1, 0], [], []>} : vector<16x8xf32>, vector<16x8xf32>, vector<16x16xf32> -> vector<16x16xf32>
    %162 = arith.addf %161, %1 : vector<16x16xf32>
    %cst_40 = arith.constant dense<0xFF800000> : vector<16xf32>
    %163 = vector.multi_reduction <maximumf>, %162, %cst_40 [1] : vector<16x16xf32> to vector<16xf32>
    %164 = vector.shape_cast %163 : vector<16xf32> to vector<16x1xf32>
    %165 = vector.broadcast %164 : vector<16x1xf32> to vector<16x16xf32>
    %166 = arith.subf %162, %165 : vector<16x16xf32>
    %167 = math.exp %166 : vector<16x16xf32>
    %cst_41 = arith.constant dense<0.000000e+00> : vector<16xf32>
    %168 = vector.multi_reduction <add>, %167, %cst_41 [1] : vector<16x16xf32> to vector<16xf32>
    %169 = vector.shape_cast %168 : vector<16xf32> to vector<16x1xf32>
    %170 = tpu.reciprocal %169 {approx = true} : vector<16x1xf32> -> vector<16x1xf32>
    %171 = vector.broadcast %170 : vector<16x1xf32> to vector<16x16xf32>
    %172 = arith.mulf %167, %171 : vector<16x16xf32>
    %cst_42 = arith.constant dense<0.000000e+00> : vector<16x8xf32>
    %173 = tpu.matmul %172, %160, %cst_42 {dimension_numbers = #tpu.dot_dimension_numbers<[1], [0], [0], [1], [0, 0, 1, 1], [], []>} : vector<16x16xf32>, vector<16x8xf32>, vector<16x8xf32> -> vector<16x8xf32>
    %174 = vector.extract_strided_slice %157 {offsets = [0, 8], sizes = [16, 8], strides = [1, 1]} : vector<16x96xf32> to vector<16x8xf32>
    %175 = vector.extract_strided_slice %157 {offsets = [0, 40], sizes = [16, 8], strides = [1, 1]} : vector<16x96xf32> to vector<16x8xf32>
    %176 = vector.extract_strided_slice %157 {offsets = [0, 72], sizes = [16, 8], strides = [1, 1]} : vector<16x96xf32> to vector<16x8xf32>
    %cst_43 = arith.constant dense<0.000000e+00> : vector<16x16xf32>
    %177 = tpu.matmul %174, %175, %cst_43 {dimension_numbers = #tpu.dot_dimension_numbers<[1], [1], [0], [0], [0, 0, 1, 0], [], []>} : vector<16x8xf32>, vector<16x8xf32>, vector<16x16xf32> -> vector<16x16xf32>
    %178 = arith.addf %177, %1 : vector<16x16xf32>
    %cst_44 = arith.constant dense<0xFF800000> : vector<16xf32>
    %179 = vector.multi_reduction <maximumf>, %178, %cst_44 [1] : vector<16x16xf32> to vector<16xf32>
    %180 = vector.shape_cast %179 : vector<16xf32> to vector<16x1xf32>
    %181 = vector.broadcast %180 : vector<16x1xf32> to vector<16x16xf32>
    %182 = arith.subf %178, %181 : vector<16x16xf32>
    %183 = math.exp %182 : vector<16x16xf32>
    %cst_45 = arith.constant dense<0.000000e+00> : vector<16xf32>
    %184 = vector.multi_reduction <add>, %183, %cst_45 [1] : vector<16x16xf32> to vector<16xf32>
    %185 = vector.shape_cast %184 : vector<16xf32> to vector<16x1xf32>
    %186 = tpu.reciprocal %185 {approx = true} : vector<16x1xf32> -> vector<16x1xf32>
    %187 = vector.broadcast %186 : vector<16x1xf32> to vector<16x16xf32>
    %188 = arith.mulf %183, %187 : vector<16x16xf32>
    %cst_46 = arith.constant dense<0.000000e+00> : vector<16x8xf32>
    %189 = tpu.matmul %188, %176, %cst_46 {dimension_numbers = #tpu.dot_dimension_numbers<[1], [0], [0], [1], [0, 0, 1, 1], [], []>} : vector<16x16xf32>, vector<16x8xf32>, vector<16x8xf32> -> vector<16x8xf32>
    %190 = vector.extract_strided_slice %157 {offsets = [0, 16], sizes = [16, 8], strides = [1, 1]} : vector<16x96xf32> to vector<16x8xf32>
    %191 = vector.extract_strided_slice %157 {offsets = [0, 48], sizes = [16, 8], strides = [1, 1]} : vector<16x96xf32> to vector<16x8xf32>
    %192 = vector.extract_strided_slice %157 {offsets = [0, 80], sizes = [16, 8], strides = [1, 1]} : vector<16x96xf32> to vector<16x8xf32>
    %cst_47 = arith.constant dense<0.000000e+00> : vector<16x16xf32>
    %193 = tpu.matmul %190, %191, %cst_47 {dimension_numbers = #tpu.dot_dimension_numbers<[1], [1], [0], [0], [0, 0, 1, 0], [], []>} : vector<16x8xf32>, vector<16x8xf32>, vector<16x16xf32> -> vector<16x16xf32>
    %194 = arith.addf %193, %1 : vector<16x16xf32>
    %cst_48 = arith.constant dense<0xFF800000> : vector<16xf32>
    %195 = vector.multi_reduction <maximumf>, %194, %cst_48 [1] : vector<16x16xf32> to vector<16xf32>
    %196 = vector.shape_cast %195 : vector<16xf32> to vector<16x1xf32>
    %197 = vector.broadcast %196 : vector<16x1xf32> to vector<16x16xf32>
    %198 = arith.subf %194, %197 : vector<16x16xf32>
    %199 = math.exp %198 : vector<16x16xf32>
    %cst_49 = arith.constant dense<0.000000e+00> : vector<16xf32>
    %200 = vector.multi_reduction <add>, %199, %cst_49 [1] : vector<16x16xf32> to vector<16xf32>
    %201 = vector.shape_cast %200 : vector<16xf32> to vector<16x1xf32>
    %202 = tpu.reciprocal %201 {approx = true} : vector<16x1xf32> -> vector<16x1xf32>
    %203 = vector.broadcast %202 : vector<16x1xf32> to vector<16x16xf32>
    %204 = arith.mulf %199, %203 : vector<16x16xf32>
    %cst_50 = arith.constant dense<0.000000e+00> : vector<16x8xf32>
    %205 = tpu.matmul %204, %192, %cst_50 {dimension_numbers = #tpu.dot_dimension_numbers<[1], [0], [0], [1], [0, 0, 1, 1], [], []>} : vector<16x16xf32>, vector<16x8xf32>, vector<16x8xf32> -> vector<16x8xf32>
    %206 = vector.extract_strided_slice %157 {offsets = [0, 24], sizes = [16, 8], strides = [1, 1]} : vector<16x96xf32> to vector<16x8xf32>
    %207 = vector.extract_strided_slice %157 {offsets = [0, 56], sizes = [16, 8], strides = [1, 1]} : vector<16x96xf32> to vector<16x8xf32>
    %208 = vector.extract_strided_slice %157 {offsets = [0, 88], sizes = [16, 8], strides = [1, 1]} : vector<16x96xf32> to vector<16x8xf32>
    %cst_51 = arith.constant dense<0.000000e+00> : vector<16x16xf32>
    %209 = tpu.matmul %206, %207, %cst_51 {dimension_numbers = #tpu.dot_dimension_numbers<[1], [1], [0], [0], [0, 0, 1, 0], [], []>} : vector<16x8xf32>, vector<16x8xf32>, vector<16x16xf32> -> vector<16x16xf32>
    %210 = arith.addf %209, %1 : vector<16x16xf32>
    %cst_52 = arith.constant dense<0xFF800000> : vector<16xf32>
    %211 = vector.multi_reduction <maximumf>, %210, %cst_52 [1] : vector<16x16xf32> to vector<16xf32>
    %212 = vector.shape_cast %211 : vector<16xf32> to vector<16x1xf32>
    %213 = vector.broadcast %212 : vector<16x1xf32> to vector<16x16xf32>
    %214 = arith.subf %210, %213 : vector<16x16xf32>
    %215 = math.exp %214 : vector<16x16xf32>
    %cst_53 = arith.constant dense<0.000000e+00> : vector<16xf32>
    %216 = vector.multi_reduction <add>, %215, %cst_53 [1] : vector<16x16xf32> to vector<16xf32>
    %217 = vector.shape_cast %216 : vector<16xf32> to vector<16x1xf32>
    %218 = tpu.reciprocal %217 {approx = true} : vector<16x1xf32> -> vector<16x1xf32>
    %219 = vector.broadcast %218 : vector<16x1xf32> to vector<16x16xf32>
    %220 = arith.mulf %215, %219 : vector<16x16xf32>
    %cst_54 = arith.constant dense<0.000000e+00> : vector<16x8xf32>
    %221 = tpu.matmul %220, %208, %cst_54 {dimension_numbers = #tpu.dot_dimension_numbers<[1], [0], [0], [1], [0, 0, 1, 1], [], []>} : vector<16x16xf32>, vector<16x8xf32>, vector<16x8xf32> -> vector<16x8xf32>
    %222 = tpu.concatenate %173, %189, %205, %221 in 1 : vector<16x8xf32>, vector<16x8xf32>, vector<16x8xf32>, vector<16x8xf32> -> vector<16x32xf32>
    %cst_55 = arith.constant dense<0.000000e+00> : vector<16x32xf32>
    %223 = tpu.matmul %222, %144, %cst_55 {dimension_numbers = #tpu.dot_dimension_numbers<[1], [0], [0], [1], [0, 0, 1, 1], [], []>} : vector<16x32xf32>, vector<32x32xf32>, vector<16x32xf32> -> vector<16x32xf32>
    %224 = vector.broadcast %148 : vector<1x32xf32> to vector<16x32xf32>
    %225 = arith.addf %223, %224 : vector<16x32xf32>
    %226 = arith.addf %140, %225 : vector<16x32xf32>
    %cst_56 = arith.constant dense<0.000000e+00> : vector<16xf32>
    %227 = vector.multi_reduction <add>, %226, %cst_56 [1] : vector<16x32xf32> to vector<16xf32>
    %228 = vector.shape_cast %227 : vector<16xf32> to vector<16x1xf32>
    %cst_57 = arith.constant 3.200000e+01 : f32
    %229 = vector.broadcast %cst_57 : f32 to vector<16x1xf32>
    %230 = arith.divf %228, %229 : vector<16x1xf32>
    %231 = vector.broadcast %230 : vector<16x1xf32> to vector<16x32xf32>
    %232 = arith.subf %226, %231 : vector<16x32xf32>
    %233 = arith.mulf %232, %232 : vector<16x32xf32>
    %cst_58 = arith.constant dense<0.000000e+00> : vector<16xf32>
    %234 = vector.multi_reduction <add>, %233, %cst_58 [1] : vector<16x32xf32> to vector<16xf32>
    %235 = vector.shape_cast %234 : vector<16xf32> to vector<16x1xf32>
    %cst_59 = arith.constant 3.200000e+01 : f32
    %236 = vector.broadcast %cst_59 : f32 to vector<16x1xf32>
    %237 = arith.divf %235, %236 : vector<16x1xf32>
    %238 = vector.broadcast %230 : vector<16x1xf32> to vector<16x32xf32>
    %239 = arith.subf %226, %238 : vector<16x32xf32>
    %cst_60 = arith.constant 9.99999974E-6 : f32
    %240 = vector.broadcast %cst_60 : f32 to vector<16x1xf32>
    %241 = arith.addf %237, %240 : vector<16x1xf32>
    %242 = math.rsqrt %241 : vector<16x1xf32>
    %243 = vector.broadcast %242 : vector<16x1xf32> to vector<16x32xf32>
    %244 = arith.mulf %239, %243 : vector<16x32xf32>
    %245 = vector.broadcast %151 : vector<1x32xf32> to vector<16x32xf32>
    %246 = arith.mulf %244, %245 : vector<16x32xf32>
    %247 = vector.broadcast %152 : vector<1x32xf32> to vector<16x32xf32>
    %248 = arith.addf %246, %247 : vector<16x32xf32>
    %cst_61 = arith.constant dense<0.000000e+00> : vector<16x64xf32>
    %249 = tpu.matmul %248, %145, %cst_61 {dimension_numbers = #tpu.dot_dimension_numbers<[1], [0], [0], [1], [0, 0, 1, 1], [], []>} : vector<16x32xf32>, vector<32x64xf32>, vector<16x64xf32> -> vector<16x64xf32>
    %250 = vector.broadcast %149 : vector<1x64xf32> to vector<16x64xf32>
    %251 = arith.addf %249, %250 : vector<16x64xf32>
    %cst_62 = arith.constant 0.000000e+00 : f32
    %252 = vector.broadcast %cst_62 : f32 to vector<16x64xf32>
    %253 = arith.maximumf %251, %252 : vector<16x64xf32>
    %cst_63 = arith.constant dense<0.000000e+00> : vector<16x32xf32>
    %254 = tpu.matmul %253, %146, %cst_63 {dimension_numbers = #tpu.dot_dimension_numbers<[1], [1], [0], [0], [0, 0, 1, 0], [], []>} : vector<16x64xf32>, vector<32x64xf32>, vector<16x32xf32> -> vector<16x32xf32>
    %255 = vector.broadcast %150 : vector<1x32xf32> to vector<16x32xf32>
    %256 = arith.addf %254, %255 : vector<16x32xf32>
    %257 = arith.addf %248, %256 : vector<16x32xf32>
    %cst_64 = arith.constant dense<0.000000e+00> : vector<16xf32>
    %258 = vector.multi_reduction <add>, %257, %cst_64 [1] : vector<16x32xf32> to vector<16xf32>
    %259 = vector.shape_cast %258 : vector<16xf32> to vector<16x1xf32>
    %cst_65 = arith.constant 3.200000e+01 : f32
    %260 = vector.broadcast %cst_65 : f32 to vector<16x1xf32>
    %261 = arith.divf %259, %260 : vector<16x1xf32>
    %262 = vector.broadcast %261 : vector<16x1xf32> to vector<16x32xf32>
    %263 = arith.subf %257, %262 : vector<16x32xf32>
    %264 = arith.mulf %263, %263 : vector<16x32xf32>
    %cst_66 = arith.constant dense<0.000000e+00> : vector<16xf32>
    %265 = vector.multi_reduction <add>, %264, %cst_66 [1] : vector<16x32xf32> to vector<16xf32>
    %266 = vector.shape_cast %265 : vector<16xf32> to vector<16x1xf32>
    %cst_67 = arith.constant 3.200000e+01 : f32
    %267 = vector.broadcast %cst_67 : f32 to vector<16x1xf32>
    %268 = arith.divf %266, %267 : vector<16x1xf32>
    %269 = vector.broadcast %261 : vector<16x1xf32> to vector<16x32xf32>
    %270 = arith.subf %257, %269 : vector<16x32xf32>
    %cst_68 = arith.constant 9.99999974E-6 : f32
    %271 = vector.broadcast %cst_68 : f32 to vector<16x1xf32>
    %272 = arith.addf %268, %271 : vector<16x1xf32>
    %273 = math.rsqrt %272 : vector<16x1xf32>
    %274 = vector.broadcast %273 : vector<16x1xf32> to vector<16x32xf32>
    %275 = arith.mulf %270, %274 : vector<16x32xf32>
    %276 = vector.broadcast %153 : vector<1x32xf32> to vector<16x32xf32>
    %277 = arith.mulf %275, %276 : vector<16x32xf32>
    %278 = vector.broadcast %154 : vector<1x32xf32> to vector<16x32xf32>
    %279 = arith.addf %277, %278 : vector<16x32xf32>
    %c0_69 = arith.constant 0 : index
    %c0_70 = arith.constant 0 : index
    %280 = vector.load %arg4[%c0_69, %c0_70] : memref<16x32xf32, #tpu.memory_space<vmem>>, vector<16x32xf32>
    tpu.vector_store %arg4[%c0_69, %c0_70], %279 {strides = array<i32>} : memref<16x32xf32, #tpu.memory_space<vmem>>, vector<16x32xf32>,
    return
  }
  func.func @transform_0(%arg0: i32) -> (i32, i32) {
    %c0_i32 = arith.constant 0 : i32
    %c0_i32_0 = arith.constant 0 : i32
    %c0_i32_1 = arith.constant 0 : i32
    return %c0_i32, %c0_i32_0 : i32, i32
  }
  func.func @transform_1(%arg0: i32) -> (i32, i32) {
    %c0_i32 = arith.constant 0 : i32
    %c0_i32_0 = arith.constant 0 : i32
    %c0_i32_1 = arith.constant 0 : i32
    return %c0_i32, %c0_i32_0 : i32, i32
  }
  func.func @transform_2(%arg0: i32) -> (i32, i32, i32) {
    %c0_i32 = arith.constant 0 : i32
    %c0_i32_0 = arith.constant 0 : i32
    %c0_i32_1 = arith.constant 0 : i32
    %c0_i32_2 = arith.constant 0 : i32
    return %c0_i32, %c0_i32_0, %c0_i32_1 : i32, i32, i32
  }
  func.func @transform_3(%arg0: i32) -> (i32, i32) {
    %c0_i32 = arith.constant 0 : i32
    %c0_i32_0 = arith.constant 0 : i32
    %c0_i32_1 = arith.constant 0 : i32
    return %c0_i32, %c0_i32_0 : i32, i32
  }
}

</mosaic_0001>

<bundles_post_ra>
// kernel: transformer_encoder_pallas.1
= control target key start
LH: loop header
LB: loop body
LE: loop exit
PB: predicated region body
PF: predicated region fallthrough
CT: control target
= control target key end

     0   :  { %vm31_vm0 = vcmask 261120   ;;  %v27_v9 = vlaneseq  ;;  %vm119_vm1 = vcmask 64512   ;;  %s3384_s26 = smov 96   ;;  %s3385_s27 = smov 88   ;;  %vm203_vm3 = vcmask 130048   ;;  %s3915_s2 = inlined_call_operand.vmem [shape: f32[2,40,256], index: 2, kind: input, shape index: {}]   ;;  %s3916_s0 = inlined_call_operand.vmem [shape: f32[16,32], index: 0, kind: input, shape index: {}]   ;;  %s3917_s1 = inlined_call_operand.vmem [shape: f32[16,16], index: 1, kind: input, shape index: {}]   ;;  %s3918_s3 = inlined_call_operand.vmem [shape: f32[16,32], index: 3, kind: output, shape index: {}]  }
   0x1   :  { %v3421_v0 = vld [vmem:[%s3915_s2] sm:$0xff]  ;;  %v3426_v1 = vld [vmem:[%s3915_s2 + $0x10] sm:$0xff]  ;;  %v3454_v8 = vld [vmem:[%s3916_s0 + $0x8] sm:$0xff]  ;;  %s3386_s5 = smov 64   ;;  %s3387_s6 = smov 80   ;;  %vm941_vm4 = vcmask 195584  }
   0x2   :  { %v3431_v2 = vld [vmem:[%s3915_s2 + $0x20] sm:$0xff]  ;;  %v3221_v3 = vpack.i.bf16 %v3426_v1, %v3421_v0  ;;  %v3014_v4 = vpack.c.bf16 %v3426_v1, %v3421_v0  ;;  %v3440_v5 = vld [vmem:[%s3915_s2 + $0x30] sm:$0xff]  ;;  %v3458_v10 = vshrl.u32 %v27_v9, 7  ;;  %vm3489_vm2 = vmpackc.low %vm119_vm1, %vm119_vm1  ;;  %s3388_s7 = smov 56   ;;  %s3389_s8 = smov 112   ;;  %vm1189_vm5 = vcmask 523264  }
   0x3   :  { %v3445_v6 = vld [vmem:[%s3916_s0] sm:$0xff]  ;;  %v3018_v7 = vpack.c.bf16 %v3440_v5, %v3431_v2  ;;  %s3383_s0 = smov 120   ;;  %v3508_v30 = vld [vmem:[%s3917_s1 + $0x8] sm:$0xff]  ;;  %s3390_s9 = smov 72   ;;  %vm3646_vm6 = vmpackc.low %vm1189_vm5, %vm1189_vm5 }
   0x4   :  { %2822 = vmatprep.mubr.msk.f32.mxu1 %vm31_vm0, %v3445_v6  ;;  %3015 = vmatprep.subr.bf16.mxu1 %v3014_v4  ;;  %v29_v11 = vsub.s32 0, %v3458_v10  ;;  %v3464_v12 = vld [vmem:[%s3915_s2 + $0x40] sm:$0xff]  ;;  %s3391_s10 = smov 104   ;;  %s3392_s11 = smov 48  }
   0x5   :  { %3017 = vmatpush3.bf16.msra.mxu1 %v3014_v4  ;;  %v3513_v31 = vld [vmem:[%s3917_s1] sm:$0xff]  ;;  %s3393_s12 = smov 32   ;;  %s3394_s13 = smov 40  }
   0x6   :  { %3019 = vmatprep.subr.bf16.mxu1 %v3018_v7  ;;  %v30_v13 = vrot.slane %v3464_v12, %v29_v11  ;;  %s3395_s14 = smov 8   ;;  %s3396_s15 = smov 16  }
   0x7   :  { %s3397_s16 = smov 24  }
   0x9   :  { %3021 = vmatpush3.bf16.msra.mxu1 %v3018_v7 }
   0xc   :  { %2823 = vmatmul.mubr.msk.f32.vlgmr.msra.gmra.mrb[0].mxu1 %vm31_vm0, %v3454_v8 }
  0xdf   :  { %v2824_v14 = vpop.f32.mrb[0].mxu1 }
  0xe0   :  { %v3469_v15 = vadd.f32 %v2824_v14, %v30_v13  ;;  %v104_v16 = vpop.f32.mrb[1].mxu1 }
  0xe1   :  { %v3471_v17 = vadd.f32 %v104_v16, %v30_v13 }
  0xe3   :  { %313 = vrot.lane.b32.xlu1 %v3471_v17, %s3383_s0  ;;  %2829 = vmatprep.mubr.msk.f32.mxu1 %vm119_vm1, %v3471_v17  ;;  %v3479_v18 = vpack.i.bf16 %v3469_v15, %v3471_v17 }
  0xe5   :  { %3182 = vrot.lane.b32.xlu0 %v3479_v18, %s3384_s26 }
  0xe7   :  { %315 = vrot.lane.b32.xlu1 %v3469_v15, %s3383_s0 }
  0xe9   :  { %3187 = vrot.lane.b32.xlu0 %v3479_v18, %s3385_s27 }
 0x155   :  { %v314_v28 = vpop.permute.xlu1 %313 }
 0x157   :  { %v3183_v19 = vpop.permute.xlu0 %3182 }
 0x158   :  { %v3185_v20 = vunpack.i.h.bf16 %v3183_v19  ;;  %v3184_v21 = vunpack.i.l.bf16 %v3183_v19 }
 0x159   :  { %v316_v29 = vpop.permute.xlu1 %315 }
 0x15a   :  { %v3022_v23 = vpack.c.bf16 %v3185_v20, %v3184_v21 }
 0x15b   :  { %v3188_v24 = vpop.permute.xlu0 %3187 }
 0x15c   :  { %v3190_v25 = vunpack.i.h.bf16 %v3188_v24  ;;  %v3189_v26 = vunpack.i.l.bf16 %v3188_v24  ;;  %3024 = vmatprep.subr.msk.bf16.mxu1 %vm3489_vm2, %v3022_v23 }
 0x15d   :  { %3027 = vmatpush3.bf16.xpose.msk.msra.mxu1 %vm3489_vm2, %v3022_v23 }
 0x15e   :  { %v3032_v27 = vpack.c.bf16 %v3190_v25, %v3189_v26 }
 0x160   :  { %3034 = vmatprep.subr.msk.bf16.mxu1 %vm3489_vm2, %v3032_v27 }
 0x164   :  { %2830 = vmatmul.mubr.msk.f32.vlgmr.msra.gmra.mrb[2].mxu1 %vm119_vm1, %v3469_v15 }
 0x165   :  { %3037 = vmatpush3.bf16.xpose.msk.msra.mxu1 %vm3489_vm2, %v3032_v27  ;;  %2843 = vmatprep.mubr.msk.f32.mxu1 %vm119_vm1, %v314_v28 }
 0x16c   :  { %2844 = vmatmul.mubr.msk.f32.vlgmr.msra.gmra.mrb[4].mxu1 %vm119_vm1, %v316_v29 }
 0x237   :  { %v2831_v32 = vpop.f32.mrb[2].mxu1 }
 0x238   :  { %v200_v33 = vadd.f32 %v2831_v32, %v3508_v30  ;;  %v194_v34 = vpop.f32.mrb[3].mxu1 }
 0x239   :  { %v195_v35 = vadd.f32 %v194_v34, %v3513_v31 }
 0x23a   :  { %v207_v36 = vsel %vm203_vm3, %v200_v33, -inf }
 0x23b   :  { %208 = vmax.xlane.f32.xlu1 %v207_v36  ;;  %v204_v37 = vsel %vm203_vm3, %v195_v35, -inf }
 0x23c   :  { %205 = vmax.xlane.f32.xlu0 %v204_v37 }
 0x23f   :  { %v2845_v38 = vpop.f32.mrb[4].mxu1 }
 0x240   :  { %v395_v39 = vpop.f32.mrb[5].mxu1  ;;  %v401_v41 = vadd.f32 %v2845_v38, %v3508_v30 }
 0x241   :  { %v396_v40 = vadd.f32 %v395_v39, %v3513_v31 }
 0x242   :  { %v407_v43 = vsel %vm203_vm3, %v401_v41, -inf }
 0x243   :  { %v404_v42 = vsel %vm203_vm3, %v396_v40, -inf }
 0x244   :  { %405 = vmax.xlane.f32.xlu0 %v404_v42 }
 0x248   :  { %408 = vmax.xlane.f32.xlu0 %v407_v43 }
 0x24c   :  { %3192 = vrot.lane.b32.xlu1 %v3479_v18, %s3386_s5 }
 0x2c8   :  { %v209_v44 = vpop.xlane.xlu1 %208 }
 0x2c9   :  { %v211_v45 = vsub.f32 %v200_v33, %v209_v44  ;;  %v206_v46 = vpop.xlane.xlu0 %205 }
 0x2ca   :  { %v210_v47 = vsub.f32 %v195_v35, %v206_v46 }
 0x2cb   :  { %v214_v48 = vmul.f32 1.442695, %v211_v45 }
 0x2cc   :  { %v212_v49 = vmul.f32 1.442695, %v210_v47  ;;  %v3193_v50 = vpop.permute.xlu1 %3192 }
 0x2cd   :  { %3301 = vpow2.f32 %v214_v48  ;;  %v3195_v51 = vunpack.i.h.bf16 %v3193_v50  ;;  %v3194_v52 = vunpack.i.l.bf16 %v3193_v50 }
 0x2ce   :  { %3303 = vpow2.f32 %v212_v49 }
 0x2cf   :  { %v3028_v53 = vpack.c.bf16 %v3195_v51, %v3194_v52 }
 0x2d1   :  { %3029 = vmatprep.subr.bf16.mxu0 %v3028_v53  ;;  %v406_v54 = vpop.xlane.xlu0 %405 }
 0x2d2   :  { %3031 = vmatpush3.bf16.msra.mxu0 %v3028_v53  ;;  %v410_v4 = vsub.f32 %v396_v40, %v406_v54 }
 0x2d4   :  { %v412_v7 = vmul.f32 1.442695, %v410_v4 }
 0x2d5   :  { %v409_v55 = vpop.xlane.xlu0 %408 }
 0x2d6   :  { %v411_v56 = vsub.f32 %v401_v41, %v409_v55 }
 0x2d7   :  { %v3302_v57 = vpop.eup %3301 }
 0x2d8   :  { %v3304_v58 = vpop.eup %3303  ;;  %v414_v59 = vmul.f32 1.442695, %v411_v56  ;;  %v219_v60 = vsel %vm203_vm3, %v3302_v57, 0.0 }
 0x2d9   :  { %220 = vadd.xlane.f32.xlu0 %v219_v60  ;;  %v216_v61 = vsel %vm203_vm3, %v3304_v58, 0.0 }
 0x2da   :  { %3305 = vpow2.f32 %v414_v59  ;;  %217 = vadd.xlane.f32.xlu1 %v216_v61 }
 0x2db   :  { %3307 = vpow2.f32 %v412_v7 }
 0x2e4   :  { %v3306_v62 = vpop.eup %3305 }
 0x2e5   :  { %v419_v63 = vsel %vm203_vm3, %v3306_v62, 0.0  ;;  %v3308_v9 = vpop.eup %3307 }
 0x2e6   :  { %420 = vadd.xlane.f32.xlu0 %v419_v63  ;;  %v416_v13 = vsel %vm203_vm3, %v3308_v9, 0.0 }
 0x2eb   :  { %3202 = vrot.lane.b32.xlu1 %v3479_v18, %s3387_s6 }
 0x2fc   :  { %3197 = vrot.lane.b32.xlu0 %v3479_v18, %s3388_s7 }
 0x300   :  { %515 = vrot.lane.b32.xlu0 %v3469_v15, %s3389_s8 }
 0x30f   :  { %417 = vadd.xlane.f32.xlu1 %v416_v13 }
 0x320   :  { %513 = vrot.lane.b32.xlu1 %v3471_v17, %s3389_s8 }
 0x366   :  { %v221_v14 = vpop.xlane.xlu0 %220 }
 0x367   :  { %3309 = vrcp.f32 %v221_v14  ;;  %v218_v16 = vpop.xlane.xlu1 %217 }
 0x368   :  { %3311 = vrcp.f32 %v218_v16 }
 0x36b   :  { %v3203_v25 = vpop.permute.xlu1 %3202 }
 0x36c   :  { %v3205_v27 = vunpack.i.h.bf16 %v3203_v25  ;;  %v3204_v28 = vunpack.i.l.bf16 %v3203_v25 }
 0x36e   :  { %v3042_v34 = vpack.c.bf16 %v3205_v27, %v3204_v28 }
 0x371   :  { %v3310_v19 = vpop.eup %3309 }
 0x372   :  { %v3312_v20 = vpop.eup %3311  ;;  %v225_v24 = vmul.f32 %v3310_v19, %v3302_v57 }
 0x373   :  { %v421_v21 = vpop.xlane.xlu0 %420  ;;  %v224_v23 = vmul.f32 %v3312_v20, %v3304_v58 }
 0x374   :  { %3313 = vrcp.f32 %v421_v21 }
 0x375   :  { %2836 = vmatprep.mubr.msk.f32.mxu0 %vm203_vm3, %v224_v23 }
 0x376   :  { %2837 = vmatmul.mubr.msk.f32.vlgmr.msra.gmra.mrb[0].mxu0 %vm203_vm3, %v225_v24 }
 0x377   :  { %v3198_v26 = vpop.permute.xlu0 %3197 }
 0x378   :  { %v3200_v29 = vunpack.i.h.bf16 %v3198_v26  ;;  %v3199_v32 = vunpack.i.l.bf16 %v3198_v26 }
 0x37a   :  { %v3038_v33 = vpack.c.bf16 %v3200_v29, %v3199_v32 }
 0x37b   :  { %v516_v41 = vpop.permute.xlu0 %515 }
 0x37c   :  { %3039 = vmatprep.subr.bf16.mxu0 %v3038_v33 }
 0x37d   :  { %3041 = vmatpush3.bf16.msra.mxu0 %v3038_v33 }
 0x37e   :  { %3044 = vmatprep.subr.msk.bf16.mxu0 %vm3489_vm2, %v3042_v34  ;;  %v3314_v36 = vpop.eup %3313 }
 0x37f   :  { %v425_v39 = vmul.f32 %v3314_v36, %v3306_v62 }
 0x39c   :  { %v418_v35 = vpop.xlane.xlu1 %417 }
 0x39d   :  { %3315 = vrcp.f32 %v418_v35 }
 0x3a0   :  { %v514_v40 = vpop.permute.xlu1 %513 }
 0x3a7   :  { %v3316_v37 = vpop.eup %3315 }
 0x3a8   :  { %v424_v38 = vmul.f32 %v3316_v37, %v3308_v9 }
 0x3aa   :  { %2850 = vmatprep.mubr.msk.f32.mxu0 %vm203_vm3, %v424_v38 }
 0x3ab   :  { %2851 = vmatmul.mubr.msk.f32.vlgmr.msra.gmra.mrb[2].mxu0 %vm203_vm3, %v425_v39 }
 0x3ac   :  { %3047 = vmatpush3.bf16.xpose.msk.msra.mxu0 %vm3489_vm2, %v3042_v34  ;;  %2857 = vmatprep.mubr.msk.f32.mxu0 %vm119_vm1, %v514_v40 }
 0x3b3   :  { %2858 = vmatmul.mubr.msk.f32.vlgmr.msra.gmra.mrb[4].mxu0 %vm119_vm1, %v516_v41 }
 0x449   :  { %v3547_v42 = vpop.f32.mrb[0].mxu0 }
 0x44a   :  { %v3549_v43 = vpop.f32.mrb[1].mxu0 }
 0x47e   :  { %v3551_v44 = vpop.f32.mrb[2].mxu0 }
 0x47f   :  { %v3553_v45 = vpop.f32.mrb[3].mxu0 }
 0x486   :  { %v2859_v46 = vpop.f32.mrb[4].mxu0 }
 0x487   :  { %v601_v47 = vadd.f32 %v2859_v46, %v3508_v30  ;;  %v595_v48 = vpop.f32.mrb[5].mxu0 }
 0x488   :  { %v596_v49 = vadd.f32 %v595_v48, %v3513_v31 }
 0x489   :  { %v607_v50 = vsel %vm203_vm3, %v601_v47, -inf }
 0x48a   :  { %608 = vmax.xlane.f32.xlu0 %v607_v50  ;;  %v604_v51 = vsel %vm203_vm3, %v596_v49, -inf  ;;  %v3226_v50 = vpack.i.bf16 %v3440_v5, %v3431_v2 }
 0x48b   :  { %605 = vmax.xlane.f32.xlu1 %v604_v51 }
 0x517   :  { %v609_v52 = vpop.xlane.xlu0 %608 }
 0x518   :  { %v611_v53 = vsub.f32 %v601_v47, %v609_v52  ;;  %v606_v54 = vpop.xlane.xlu1 %605 }
 0x519   :  { %v610_v55 = vsub.f32 %v596_v49, %v606_v54 }
 0x51a   :  { %v614_v56 = vmul.f32 1.442695, %v611_v53 }
 0x51b   :  { %v612_v57 = vmul.f32 1.442695, %v610_v55 }
 0x51c   :  { %3317 = vpow2.f32 %v614_v56 }
 0x51d   :  { %3319 = vpow2.f32 %v612_v57 }
 0x526   :  { %v3318_v58 = vpop.eup %3317 }
 0x527   :  { %v3320_v59 = vpop.eup %3319  ;;  %v619_v60 = vsel %vm203_vm3, %v3318_v58, 0.0 }
 0x528   :  { %620 = vadd.xlane.f32.xlu1 %v619_v60  ;;  %v616_v61 = vsel %vm203_vm3, %v3320_v59, 0.0 }
 0x529   :  { %617 = vadd.xlane.f32.xlu0 %v616_v61 }
 0x539   :  { %3212 = vrot.lane.b32.xlu1 %v3479_v18, %s3390_s9 }
 0x53d   :  { %713 = vrot.lane.b32.xlu1 %v3471_v17, %s3391_s10 }
 0x53f   :  { %3207 = vrot.lane.b32.xlu0 %v3479_v18, %s3392_s11 }
 0x543   :  { %715 = vrot.lane.b32.xlu0 %v3469_v15, %s3391_s10 }
 0x5b5   :  { %v621_v62 = vpop.xlane.xlu1 %620 }
 0x5b6   :  { %3321 = vrcp.f32 %v621_v62  ;;  %v618_v63 = vpop.xlane.xlu0 %617 }
 0x5b7   :  { %3323 = vrcp.f32 %v618_v63 }
 0x5b9   :  { %v3213_v4 = vpop.permute.xlu1 %3212 }
 0x5ba   :  { %v3208_v7 = vpop.permute.xlu0 %3207  ;;  %v3215_v9 = vunpack.i.h.bf16 %v3213_v4  ;;  %v3214_v13 = vunpack.i.l.bf16 %v3213_v4 }
 0x5bb   :  { %v3210_v14 = vunpack.i.h.bf16 %v3208_v7  ;;  %v3209_v16 = vunpack.i.l.bf16 %v3208_v7 }
 0x5bc   :  { %v3052_v20 = vpack.c.bf16 %v3215_v9, %v3214_v13 }
 0x5bd   :  { %v3048_v19 = vpack.c.bf16 %v3210_v14, %v3209_v16  ;;  %v714_v24 = vpop.permute.xlu1 %713 }
 0x5be   :  { %v716_v25 = vpop.permute.xlu0 %715 }
 0x5bf   :  { %3049 = vmatprep.subr.bf16.mxu1 %v3048_v19 }
 0x5c0   :  { %v3322_v17 = vpop.eup %3321  ;;  %3051 = vmatpush3.bf16.msra.mxu1 %v3048_v19 }
 0x5c1   :  { %v3324_v21 = vpop.eup %3323  ;;  %3054 = vmatprep.subr.msk.bf16.mxu1 %vm3489_vm2, %v3052_v20  ;;  %v625_v23 = vmul.f32 %v3322_v17, %v3318_v58 }
 0x5c2   :  { %v624_v15 = vmul.f32 %v3324_v21, %v3320_v59 }
 0x5c4   :  { %2864 = vmatprep.mubr.msk.f32.mxu1 %vm203_vm3, %v624_v15 }
 0x5c5   :  { %2865 = vmatmul.mubr.msk.f32.vlgmr.msra.gmra.mrb[6].mxu1 %vm203_vm3, %v625_v23  ;;  %v946_v23 = vsub.s32 1, %v3458_v10 }
 0x5c6   :  { %2871 = vmatprep.mubr.msk.f32.mxu1 %vm119_vm1, %v714_v24 }
 0x5c9   :  { %3057 = vmatpush3.bf16.xpose.msk.msra.mxu1 %vm3489_vm2, %v3052_v20 }
 0x5d0   :  { %2872 = vmatmul.mubr.msk.f32.vlgmr.msra.gmra.mrb[8].mxu1 %vm119_vm1, %v716_v25 }
 0x698   :  { %v2866_v26 = vpop.f32.mrb[6].mxu1 }
 0x699   :  { %v704_v27 = vpop.f32.mrb[7].mxu1 }
 0x6a3   :  { %v2873_v28 = vpop.f32.mrb[8].mxu1 }
 0x6a4   :  { %v801_v29 = vadd.f32 %v2873_v28, %v3508_v30  ;;  %v795_v32 = vpop.f32.mrb[9].mxu1 }
 0x6a5   :  { %v796_v33 = vadd.f32 %v795_v32, %v3513_v31 }
 0x6a6   :  { %v807_v34 = vsel %vm203_vm3, %v801_v29, -inf }
 0x6a7   :  { %808 = vmax.xlane.f32.xlu0 %v807_v34  ;;  %v804_v35 = vsel %vm203_vm3, %v796_v33, -inf }
 0x6a8   :  { %805 = vmax.xlane.f32.xlu1 %v804_v35 }
 0x734   :  { %v809_v36 = vpop.xlane.xlu0 %808 }
 0x735   :  { %v811_v37 = vsub.f32 %v801_v29, %v809_v36  ;;  %v806_v38 = vpop.xlane.xlu1 %805 }
 0x736   :  { %v810_v39 = vsub.f32 %v796_v33, %v806_v38 }
 0x737   :  { %v814_v40 = vmul.f32 1.442695, %v811_v37 }
 0x738   :  { %v812_v41 = vmul.f32 1.442695, %v810_v39 }
 0x739   :  { %3325 = vpow2.f32 %v814_v40 }
 0x73a   :  { %3327 = vpow2.f32 %v812_v41 }
 0x743   :  { %v3326_v46 = vpop.eup %3325 }
 0x744   :  { %v3328_v47 = vpop.eup %3327  ;;  %v819_v48 = vsel %vm203_vm3, %v3326_v46, 0.0 }
 0x745   :  { %820 = vadd.xlane.f32.xlu1 %v819_v48  ;;  %v816_v49 = vsel %vm203_vm3, %v3328_v47, 0.0  ;;  %v23_v48 = vld [vmem:[%s3915_s2 + $0x28] sm:$0xff] }
 0x746   :  { %817 = vadd.xlane.f32.xlu0 %v816_v49  ;;  %v25_v49 = vld [vmem:[%s3915_s2 + $0x38] sm:$0xff] }
 0x756   :  { %3222 = vrot.lane.b32.xlu1 %v3221_v3, %s3393_s12 }
 0x75a   :  { %3227 = vrot.lane.b32.xlu1 %v3226_v50, %s3393_s12  ;;  %v3074_v50 = vpack.c.bf16 %v25_v49, %v23_v48 }
 0x75c   :  { %3217 = vrot.lane.b32.xlu0 %v3479_v18, %s3394_s13 }
 0x75e   :  { %917 = vrot.lane.b32.xlu1 %v3551_v44, %s3395_s14 }
 0x760   :  { %915 = vrot.lane.b32.xlu0 %v3553_v45, %s3395_s14 }
 0x762   :  { %925 = vrot.lane.b32.xlu1 %v2866_v26, %s3396_s15 }
 0x764   :  { %923 = vrot.lane.b32.xlu0 %v704_v27, %s3396_s15 }
 0x7d2   :  { %v821_v0 = vpop.xlane.xlu1 %820 }
 0x7d3   :  { %3329 = vrcp.f32 %v821_v0  ;;  %v818_v1 = vpop.xlane.xlu0 %817 }
 0x7d4   :  { %3331 = vrcp.f32 %v818_v1  ;;  %v3236_v1 = vpack.i.bf16 %v25_v49, %v23_v48 }
 0x7d6   :  { %v3223_v2 = vpop.permute.xlu1 %3222 }
 0x7d7   :  { %v3225_v3 = vunpack.i.h.bf16 %v3223_v2  ;;  %v3224_v5 = vunpack.i.l.bf16 %v3223_v2  ;;  %v3218_v18 = vpop.permute.xlu0 %3217 }
 0x7d8   :  { %v3220_v51 = vunpack.i.h.bf16 %v3218_v18  ;;  %v3219_v52 = vunpack.i.l.bf16 %v3218_v18 }
 0x7d9   :  { %v3062_v53 = vpack.c.bf16 %v3225_v3, %v3224_v5 }
 0x7da   :  { %v3058_v44 = vpack.c.bf16 %v3220_v51, %v3219_v52  ;;  %v3228_v54 = vpop.permute.xlu1 %3227 }
 0x7db   :  { %v3230_v55 = vunpack.i.h.bf16 %v3228_v54  ;;  %v3229_v45 = vunpack.i.l.bf16 %v3228_v54  ;;  %v916_v4 = vpop.permute.xlu0 %915 }
 0x7dc   :  { %3059 = vmatprep.subr.bf16.mxu0 %v3058_v44  ;;  %v937_v13 = vsel %vm119_vm1, %v3549_v43, %v916_v4  ;;  %v947_v43 = vrot.slane %v3464_v12, %v946_v23 }
 0x7dd   :  { %v3330_v56 = vpop.eup %3329  ;;  %3061 = vmatpush3.bf16.msra.mxu0 %v3058_v44  ;;  %v3066_v60 = vpack.c.bf16 %v3230_v55, %v3229_v45  ;;  %v1082_v44 = vsub.s32 5, %v3458_v10 }
 0x7de   :  { %v3332_v57 = vpop.eup %3331  ;;  %3063 = vmatprep.subr.bf16.mxu0 %v3062_v53  ;;  %v825_v59 = vmul.f32 %v3330_v56, %v3326_v46  ;;  %v918_v63 = vpop.permute.xlu1 %917  ;;  %v21_v46 = vld [vmem:[%s3915_s2 + $0x18] sm:$0xff] }
 0x7df   :  { %v824_v58 = vmul.f32 %v3332_v57, %v3328_v47  ;;  %v924_v9 = vpop.permute.xlu0 %923  ;;  %v938_v16 = vsel %vm119_vm1, %v3547_v42, %v918_v63 }
 0x7e0   :  { %v939_v19 = vsel %vm203_vm3, %v937_v13, %v924_v9 }
 0x7e1   :  { %2878 = vmatprep.mubr.msk.f32.mxu0 %vm203_vm3, %v824_v58 }
 0x7e2   :  { %2879 = vmatmul.mubr.msk.f32.vlgmr.msra.gmra.mrb[6].mxu0 %vm203_vm3, %v825_v59  ;;  %v926_v7 = vpop.permute.xlu1 %925 }
 0x7e3   :  { %3065 = vmatpush3.bf16.msra.mxu0 %v3062_v53  ;;  %v940_v17 = vsel %vm203_vm3, %v938_v16, %v926_v7  ;;  %v1076_v53 = vsub.s32 4, %v3458_v10 }
 0x7e4   :  { %3067 = vmatprep.subr.bf16.mxu0 %v3066_v60 }
 0x7e5   :  { %v1077_v54 = vrot.slane %v3464_v12, %v1076_v53 }
 0x7e7   :  { %3069 = vmatpush3.bf16.msra.mxu0 %v3066_v60 }
 0x8b5   :  { %v2880_v61 = vpop.f32.mrb[6].mxu0 }
 0x8b6   :  { %933 = vrot.lane.b32.xlu1 %v2880_v61, %s3397_s16  ;;  %v904_v62 = vpop.f32.mrb[7].mxu0 }
 0x8b7   :  { %931 = vrot.lane.b32.xlu0 %v904_v62, %s3397_s16  ;;  %v1083_v62 = vrot.slane %v3464_v12, %v1082_v44 }
 0x928   :  { %v934_v14 = vpop.permute.xlu1 %933 }
 0x929   :  { %v932_v20 = vpop.permute.xlu0 %931  ;;  %v943_v15 = vsel %vm941_vm4, %v940_v17, %v934_v14  ;;  %v1088_v17 = vsub.s32 2, %v3458_v10 }
 0x92a   :  { %v942_v21 = vsel %vm941_vm4, %v939_v19, %v932_v20 }
 0x92b   :  { %2889 = vmatprep.mubr.msk.f32.mxu0 %vm31_vm0, %v942_v21  ;;  %v1089_v21 = vrot.slane %v3464_v12, %v1088_v17 }
 0x92c   :  { %2890 = vmatmul.mubr.msk.f32.vlgmr.msra.gmra.mrb[8].mxu0 %vm31_vm0, %v943_v15 }
 0x9ff   :  { %v2891_v42 = vpop.f32.mrb[8].mxu0 }
 0xa00   :  { %v1042_v24 = vadd.f32 %v2891_v42, %v947_v43  ;;  %v1036_v25 = vpop.f32.mrb[9].mxu0 }
 0xa01   :  { %v1037_v26 = vadd.f32 %v1036_v25, %v947_v43 }
 0xa02   :  { %v1046_v27 = vadd.f32 %v1042_v24, %v3454_v8 }
 0xa03   :  { %v1045_v28 = vadd.f32 %v1037_v26, %v3445_v6  ;;  %v19_v6 = vld [vmem:[%s3915_s2 + $0x8] sm:$0xff] }
 0xa04   :  { %v1050_v29 = vsel %vm31_vm0, %v1046_v27, 0.0  ;;  %v3070_v47 = vpack.c.bf16 %v21_v46, %v19_v6  ;;  %v3231_v0 = vpack.i.bf16 %v21_v46, %v19_v6 }
 0xa05   :  { %1051 = vadd.xlane.f32.xlu1 %v1050_v29  ;;  %v1047_v32 = vsel %vm31_vm0, %v1045_v28, 0.0 }
 0xa06   :  { %1048 = vadd.xlane.f32.xlu0 %v1047_v32  ;;  %3071 = vmatprep.subr.bf16.mxu1 %v3070_v47 }
 0xa07   :  { %3073 = vmatpush3.bf16.msra.mxu1 %v3070_v47 }
 0xa08   :  { %3075 = vmatprep.subr.bf16.mxu1 %v3074_v50 }
 0xa0b   :  { %3077 = vmatpush3.bf16.msra.mxu1 %v3074_v50 }
 0xa16   :  { %3232 = vrot.lane.b32.xlu1 %v3231_v0, %s3386_s5  ;;  %v3677_v0 = vld [vmem:[%s3915_s2 + $0x50] sm:$0xff] }
 0xa92   :  { %v1052_v33 = vpop.xlane.xlu1 %1051 }
 0xa93   :  { %v1055_v34 = vmul.f32 0.03125, %v1052_v33  ;;  %v1049_v35 = vpop.xlane.xlu0 %1048 }
 0xa94   :  { %v1054_v36 = vmul.f32 0.03125, %v1049_v35 }
 0xa95   :  { %v1057_v37 = vsub.f32 %v1046_v27, %v1055_v34  ;;  %v1175_v27 = vsub.s32 3, %v3458_v10 }
 0xa96   :  { %v1056_v38 = vsub.f32 %v1045_v28, %v1054_v36  ;;  %v3233_v55 = vpop.permute.xlu1 %3232 }
 0xa97   :  { %v1059_v41 = vmul.f32 %v1057_v37, %v1057_v37  ;;  %v3235_v57 = vunpack.i.h.bf16 %v3233_v55  ;;  %v3234_v58 = vunpack.i.l.bf16 %v3233_v55  ;;  %v1176_v28 = vrot.slane %v3464_v12, %v1175_v27 }
 0xa98   :  { %v1058_v39 = vmul.f32 %v1056_v38, %v1056_v38 }
 0xa99   :  { %v1063_v8 = vsel %vm31_vm0, %v1059_v41, 0.0  ;;  %v3078_v4 = vpack.c.bf16 %v3235_v57, %v3234_v58  ;;  %v1309_v57 = vsub.s32 6, %v3458_v10  ;;  %v1315_v58 = vsub.s32 7, %v3458_v10 }
 0xa9a   :  { %v1060_v40 = vsel %vm31_vm0, %v1058_v39, 0.0 }
 0xa9b   :  { %1061 = vadd.xlane.f32.xlu0 %v1060_v40  ;;  %3080 = vmatprep.subr.msk.bf16.mxu0 %vm3646_vm6, %v3078_v4 }
 0xa9c   :  { %3083 = vmatpush3.bf16.xpose.msk.msra.mxu0 %vm3646_vm6, %v3078_v4 }
 0xa9f   :  { %1064 = vadd.xlane.f32.xlu0 %v1063_v8 }
 0xab5   :  { %3237 = vrot.lane.b32.xlu0 %v3236_v1, %s3386_s5  ;;  %v3682_v1 = vld [vmem:[%s3915_s2 + $0x60] sm:$0xff] }
 0xb28   :  { %v1062_v2 = vpop.xlane.xlu0 %1061 }
 0xb29   :  { %v1066_v3 = vmul.f32 0.03125, %v1062_v2  ;;  %v3090_v2 = vpack.c.bf16 %v3682_v1, %v3677_v0 }
 0xb2b   :  { %v1068_v5 = vadd.f32 1e-05, %v1066_v3  ;;  %v3689_v3 = vld [vmem:[%s3915_s2 + $0x70] sm:$0xff]  ;;  %3091 = vmatprep.subr.bf16.mxu1 %v3090_v2 }
 0xb2c   :  { %v1065_v18 = vpop.xlane.xlu0 %1064 }
 0xb2d   :  { %3333 = vrsqrt.f32 %v1068_v5  ;;  %v1067_v51 = vmul.f32 0.03125, %v1065_v18  ;;  %v3694_v5 = vld [vmem:[%s3915_s2 + $0x80] sm:$0xff] }
 0xb2e   :  { %v3094_v18 = vpack.c.bf16 %v3694_v5, %v3689_v3 }
 0xb2f   :  { %v1069_v52 = vadd.f32 1e-05, %v1067_v51 }
 0xb30   :  { %v3238_v45 = vpop.permute.xlu0 %3237 }
 0xb31   :  { %3335 = vrsqrt.f32 %v1069_v52  ;;  %v3240_v59 = vunpack.i.h.bf16 %v3238_v45  ;;  %v3239_v60 = vunpack.i.l.bf16 %v3238_v45 }
 0xb33   :  { %v3084_v7 = vpack.c.bf16 %v3240_v59, %v3239_v60  ;;  %v1310_v59 = vrot.slane %v3464_v12, %v1309_v57 }
 0xb35   :  { %3086 = vmatprep.subr.msk.bf16.mxu0 %vm3646_vm6, %v3084_v7 }
 0xb36   :  { %3089 = vmatpush3.bf16.xpose.msk.msra.mxu0 %vm3646_vm6, %v3084_v7  ;;  %v1316_v7 = vrot.slane %v3464_v12, %v1315_v58 }
 0xb37   :  { %v3334_v56 = vpop.eup %3333 }
 0xb38   :  { %v1072_v61 = vmul.f32 %v3334_v56, %v1056_v38 }
 0xb3a   :  { %v1078_v9 = vmul.f32 %v1077_v54, %v1072_v61 }
 0xb3b   :  { %v3336_v13 = vpop.eup %3335 }
 0xb3c   :  { %v1073_v14 = vmul.f32 %v3336_v13, %v1057_v37  ;;  %v1084_v16 = vadd.f32 %v1083_v62, %v1078_v9 }
 0xb3e   :  { %v1079_v19 = vmul.f32 %v1077_v54, %v1073_v14  ;;  %2900 = vmatprep.mubr.msk.f32.mxu1 %vm31_vm0, %v1084_v16 }
 0xb40   :  { %v1085_v20 = vadd.f32 %v1083_v62, %v1079_v19  ;;  %v3717_v19 = vld [vmem:[%s3915_s2 + $0x90] sm:$0xff] }
 0xb41   :  { %v1332_v12 = vrot.slane %v3717_v19, %v29_v11 }
 0xb42   :  { %2901 = vmatmul.mubr.msk.f32.vlgmr.msra.gmra.mrb[10].mxu1 %vm31_vm0, %v1085_v20 }
 0xb43   :  { %3093 = vmatpush3.bf16.msra.mxu1 %v3090_v2 }
 0xb44   :  { %3095 = vmatprep.subr.bf16.mxu1 %v3094_v18 }
 0xb47   :  { %3097 = vmatpush3.bf16.msra.mxu1 %v3094_v18 }
 0xc15   :  { %v2902_v15 = vpop.f32.mrb[10].mxu1 }
 0xc16   :  { %v1168_v43 = vadd.f32 %v2902_v15, %v1089_v21  ;;  %v1162_v42 = vpop.f32.mrb[11].mxu1 }
 0xc17   :  { %v1163_v24 = vadd.f32 %v1162_v42, %v1089_v21 }
 0xc18   :  { %v1172_v26 = vmax.f32 %v1168_v43, 0.0 }
 0xc19   :  { %v1171_v25 = vmax.f32 %v1163_v24, 0.0 }
 0xc1b   :  { %2911 = vmatprep.mubr.msk.f32.mxu0 %vm1189_vm5, %v1171_v25 }
 0xc1c   :  { %2912 = vmatmul.mubr.msk.f32.vlgmr.msra.gmra.mrb[10].mxu0 %vm1189_vm5, %v1172_v26 }
 0xcef   :  { %v2913_v29 = vpop.f32.mrb[10].mxu0 }
 0xcf0   :  { %v1276_v32 = vadd.f32 %v2913_v29, %v1176_v28  ;;  %v1270_v33 = vpop.f32.mrb[11].mxu0 }
 0xcf1   :  { %v1271_v34 = vadd.f32 %v1270_v33, %v1176_v28 }
 0xcf2   :  { %v1280_v35 = vadd.f32 %v1276_v32, %v1085_v20 }
 0xcf3   :  { %v1279_v36 = vadd.f32 %v1271_v34, %v1084_v16 }
 0xcf4   :  { %v1284_v37 = vsel %vm31_vm0, %v1280_v35, 0.0 }
 0xcf5   :  { %1285 = vadd.xlane.f32.xlu0 %v1284_v37  ;;  %v1281_v38 = vsel %vm31_vm0, %v1279_v36, 0.0 }
 0xcf6   :  { %1282 = vadd.xlane.f32.xlu1 %v1281_v38 }
 0xd82   :  { %v1286_v39 = vpop.xlane.xlu0 %1285 }
 0xd83   :  { %v1288_v40 = vmul.f32 0.03125, %v1286_v39  ;;  %v1283_v41 = vpop.xlane.xlu1 %1282 }
 0xd84   :  { %v1287_v8 = vmul.f32 0.03125, %v1283_v41 }
 0xd85   :  { %v1290_v6 = vsub.f32 %v1280_v35, %v1288_v40 }
 0xd86   :  { %v1289_v46 = vsub.f32 %v1279_v36, %v1287_v8 }
 0xd87   :  { %v1292_v47 = vmul.f32 %v1290_v6, %v1290_v6 }
 0xd88   :  { %v1291_v48 = vmul.f32 %v1289_v46, %v1289_v46 }
 0xd89   :  { %v1296_v49 = vsel %vm31_vm0, %v1292_v47, 0.0 }
 0xd8a   :  { %1297 = vadd.xlane.f32.xlu0 %v1296_v49  ;;  %v1293_v50 = vsel %vm31_vm0, %v1291_v48, 0.0 }
 0xd8b   :  { %1294 = vadd.xlane.f32.xlu1 %v1293_v50 }
 0xe17   :  { %v1298_v51 = vpop.xlane.xlu0 %1297 }
 0xe18   :  { %v1300_v52 = vmul.f32 0.03125, %v1298_v51  ;;  %v1295_v54 = vpop.xlane.xlu1 %1294 }
 0xe19   :  { %v1299_v55 = vmul.f32 0.03125, %v1295_v54 }
 0xe1a   :  { %v1302_v45 = vadd.f32 1e-05, %v1300_v52 }
 0xe1b   :  { %v1301_v56 = vadd.f32 1e-05, %v1299_v55 }
 0xe1c   :  { %3337 = vrsqrt.f32 %v1302_v45 }
 0xe1d   :  { %3339 = vrsqrt.f32 %v1301_v56 }
 0xe26   :  { %v3338_v60 = vpop.eup %3337 }
 0xe27   :  { %v3340_v61 = vpop.eup %3339  ;;  %v1306_v62 = vmul.f32 %v3338_v60, %v1290_v6 }
 0xe28   :  { %v1305_v4 = vmul.f32 %v3340_v61, %v1289_v46 }
 0xe29   :  { %v1312_v9 = vmul.f32 %v1310_v59, %v1306_v62 }
 0xe2a   :  { %v1311_v13 = vmul.f32 %v1310_v59, %v1305_v4 }
 0xe2b   :  { %v3708_v16 = vadd.f32 %v1316_v7, %v1312_v9 }
 0xe2c   :  { %v3706_v14 = vadd.f32 %v1316_v7, %v1311_v13 }
 0xe2e   :  { %2922 = vmatprep.mubr.msk.f32.mxu1 %vm31_vm0, %v3706_v14 }
 0xe2f   :  { %2923 = vmatmul.mubr.msk.f32.vlgmr.msra.gmra.mrb[12].mxu1 %vm31_vm0, %v3708_v16 }
 0xf02   :  { %v2924_v20 = vpop.f32.mrb[12].mxu1 }
 0xf03   :  { %v3722_v21 = vadd.f32 %v2924_v20, %v1332_v12  ;;  %v1405_v15 = vpop.f32.mrb[13].mxu1 }
 0xf04   :  { %v3724_v43 = vadd.f32 %v1405_v15, %v1332_v12 }
 0xf06   :  { %2929 = vmatprep.mubr.msk.f32.mxu1 %vm119_vm1, %v3724_v43  ;;  %v3730_v42 = vpack.i.bf16 %v3722_v21, %v3724_v43 }
 0xf08   :  { %3247 = vrot.lane.b32.xlu0 %v3730_v42, %s3385_s27  ;;  %3242 = vrot.lane.b32.xlu1 %v3730_v42, %s3384_s26 }
 0xf0c   :  { %1612 = vrot.lane.b32.xlu1 %v3724_v43, %s3383_s0 }
 0xf10   :  { %1614 = vrot.lane.b32.xlu1 %v3722_v21, %s3383_s0 }
 0xf7a   :  { %v3248_v11 = vpop.permute.xlu0 %3247  ;;  %v3243_v24 = vpop.permute.xlu1 %3242 }
 0xf7b   :  { %v3250_v25 = vunpack.i.h.bf16 %v3248_v11  ;;  %v3249_v26 = vunpack.i.l.bf16 %v3248_v11  ;;  %v3245_v28 = vunpack.i.h.bf16 %v3243_v24  ;;  %v3244_v29 = vunpack.i.l.bf16 %v3243_v24 }
 0xf7d   :  { %v3098_v32 = vpack.c.bf16 %v3245_v28, %v3244_v29  ;;  %v3108_v33 = vpack.c.bf16 %v3250_v25, %v3249_v26 }
 0xf7e   :  { %v1613_v34 = vpop.permute.xlu1 %1612 }
 0xf7f   :  { %3100 = vmatprep.subr.msk.bf16.mxu1 %vm3489_vm2, %v3098_v32 }
 0xf80   :  { %3103 = vmatpush3.bf16.xpose.msk.msra.mxu1 %vm3489_vm2, %v3098_v32 }
 0xf81   :  { %3110 = vmatprep.subr.msk.bf16.mxu1 %vm3489_vm2, %v3108_v33 }
 0xf82   :  { %v1615_v35 = vpop.permute.xlu1 %1614 }
 0xf87   :  { %2930 = vmatmul.mubr.msk.f32.vlgmr.msra.gmra.mrb[14].mxu1 %vm119_vm1, %v3722_v21 }
 0xf88   :  { %3113 = vmatpush3.bf16.xpose.msk.msra.mxu1 %vm3489_vm2, %v3108_v33  ;;  %2943 = vmatprep.mubr.msk.f32.mxu1 %vm119_vm1, %v1613_v34 }
 0xf8f   :  { %2944 = vmatmul.mubr.msk.f32.vlgmr.msra.gmra.mrb[16].mxu1 %vm119_vm1, %v1615_v35 }
0x105a   :  { %v2931_v36 = vpop.f32.mrb[14].mxu1 }
0x105b   :  { %v1500_v37 = vadd.f32 %v2931_v36, %v3508_v30  ;;  %v1494_v38 = vpop.f32.mrb[15].mxu1 }
0x105c   :  { %v1495_v39 = vadd.f32 %v1494_v38, %v3513_v31 }
0x105d   :  { %v1506_v40 = vsel %vm203_vm3, %v1500_v37, -inf }
0x105e   :  { %1507 = vmax.xlane.f32.xlu1 %v1506_v40  ;;  %v1503_v41 = vsel %vm203_vm3, %v1495_v39, -inf }
0x105f   :  { %1504 = vmax.xlane.f32.xlu0 %v1503_v41 }
0x1062   :  { %v2945_v8 = vpop.f32.mrb[16].mxu1 }
0x1063   :  { %v1694_v6 = vpop.f32.mrb[17].mxu1  ;;  %v1700_v47 = vadd.f32 %v2945_v8, %v3508_v30 }
0x1064   :  { %v1695_v46 = vadd.f32 %v1694_v6, %v3513_v31 }
0x1065   :  { %v1706_v49 = vsel %vm203_vm3, %v1700_v47, -inf }
0x1066   :  { %v1703_v48 = vsel %vm203_vm3, %v1695_v46, -inf }
0x1067   :  { %1704 = vmax.xlane.f32.xlu0 %v1703_v48 }
0x106b   :  { %1707 = vmax.xlane.f32.xlu0 %v1706_v49 }
0x106f   :  { %3252 = vrot.lane.b32.xlu1 %v3730_v42, %s3386_s5 }
0x10eb   :  { %v1508_v50 = vpop.xlane.xlu1 %1507 }
0x10ec   :  { %v1510_v2 = vsub.f32 %v1500_v37, %v1508_v50  ;;  %v1505_v18 = vpop.xlane.xlu0 %1504 }
0x10ed   :  { %v1509_v51 = vsub.f32 %v1495_v39, %v1505_v18 }
0x10ee   :  { %v1513_v52 = vmul.f32 1.442695, %v1510_v2 }
0x10ef   :  { %v1511_v54 = vmul.f32 1.442695, %v1509_v51  ;;  %v3253_v55 = vpop.permute.xlu1 %3252 }
0x10f0   :  { %3341 = vpow2.f32 %v1513_v52  ;;  %v3255_v31 = vunpack.i.h.bf16 %v3253_v55  ;;  %v3254_v45 = vunpack.i.l.bf16 %v3253_v55 }
0x10f1   :  { %3343 = vpow2.f32 %v1511_v54 }
0x10f2   :  { %v3104_v30 = vpack.c.bf16 %v3255_v31, %v3254_v45  ;;  %v3381_v31 = vld [vmem:[%s3917_s1 + $0x8] sm:$0xff] }
0x10f4   :  { %3105 = vmatprep.subr.bf16.mxu0 %v3104_v30  ;;  %v1705_v56 = vpop.xlane.xlu0 %1704 }
0x10f5   :  { %3107 = vmatpush3.bf16.msra.mxu0 %v3104_v30  ;;  %v1709_v20 = vsub.f32 %v1695_v46, %v1705_v56  ;;  %v3382_v56 = vld [vmem:[%s3917_s1] sm:$0xff] }
0x10f7   :  { %v1711_v15 = vmul.f32 1.442695, %v1709_v20 }
0x10f8   :  { %v1708_v59 = vpop.xlane.xlu0 %1707 }
0x10f9   :  { %v1710_v60 = vsub.f32 %v1700_v47, %v1708_v59 }
0x10fa   :  { %v3342_v61 = vpop.eup %3341 }
0x10fb   :  { %v3344_v62 = vpop.eup %3343  ;;  %v1713_v4 = vmul.f32 1.442695, %v1710_v60  ;;  %v1518_v7 = vsel %vm203_vm3, %v3342_v61, 0.0 }
0x10fc   :  { %1519 = vadd.xlane.f32.xlu0 %v1518_v7  ;;  %v1515_v9 = vsel %vm203_vm3, %v3344_v62, 0.0 }
0x10fd   :  { %3345 = vpow2.f32 %v1713_v4  ;;  %1516 = vadd.xlane.f32.xlu1 %v1515_v9 }
0x10fe   :  { %3347 = vpow2.f32 %v1711_v15 }
0x1107   :  { %v3346_v13 = vpop.eup %3345 }
0x1108   :  { %v1718_v12 = vsel %vm203_vm3, %v3346_v13, 0.0  ;;  %v3348_v11 = vpop.eup %3347 }
0x1109   :  { %1719 = vadd.xlane.f32.xlu0 %v1718_v12  ;;  %v1715_v24 = vsel %vm203_vm3, %v3348_v11, 0.0 }
0x110e   :  { %3262 = vrot.lane.b32.xlu1 %v3730_v42, %s3387_s6 }
0x111f   :  { %3257 = vrot.lane.b32.xlu0 %v3730_v42, %s3388_s7 }
0x1123   :  { %1814 = vrot.lane.b32.xlu0 %v3722_v21, %s3389_s8 }
0x1132   :  { %1716 = vadd.xlane.f32.xlu1 %v1715_v24 }
0x1143   :  { %1812 = vrot.lane.b32.xlu1 %v3724_v43, %s3389_s8 }
0x1189   :  { %v1520_v25 = vpop.xlane.xlu0 %1519 }
0x118a   :  { %3349 = vrcp.f32 %v1520_v25  ;;  %v1517_v26 = vpop.xlane.xlu1 %1516 }
0x118b   :  { %3351 = vrcp.f32 %v1517_v26 }
0x118e   :  { %v3263_v35 = vpop.permute.xlu1 %3262 }
0x118f   :  { %v3265_v37 = vunpack.i.h.bf16 %v3263_v35  ;;  %v3264_v38 = vunpack.i.l.bf16 %v3263_v35 }
0x1191   :  { %v3118_v8 = vpack.c.bf16 %v3265_v37, %v3264_v38 }
0x1194   :  { %v3350_v28 = vpop.eup %3349 }
0x1195   :  { %v3352_v29 = vpop.eup %3351  ;;  %v1524_v34 = vmul.f32 %v3350_v28, %v3342_v61 }
0x1196   :  { %v1720_v32 = vpop.xlane.xlu0 %1719  ;;  %v1523_v33 = vmul.f32 %v3352_v29, %v3344_v62 }
0x1197   :  { %3353 = vrcp.f32 %v1720_v32 }
0x1198   :  { %2936 = vmatprep.mubr.msk.f32.mxu0 %vm203_vm3, %v1523_v33 }
0x1199   :  { %2937 = vmatmul.mubr.msk.f32.vlgmr.msra.gmra.mrb[12].mxu0 %vm203_vm3, %v1524_v34 }
0x119a   :  { %v3258_v36 = vpop.permute.xlu0 %3257 }
0x119b   :  { %v3260_v39 = vunpack.i.h.bf16 %v3258_v36  ;;  %v3259_v40 = vunpack.i.l.bf16 %v3258_v36 }
0x119d   :  { %v3114_v41 = vpack.c.bf16 %v3260_v39, %v3259_v40 }
0x119e   :  { %v1815_v2 = vpop.permute.xlu0 %1814 }
0x119f   :  { %3115 = vmatprep.subr.bf16.mxu0 %v3114_v41 }
0x11a0   :  { %3117 = vmatpush3.bf16.msra.mxu0 %v3114_v41 }
0x11a1   :  { %3120 = vmatprep.subr.msk.bf16.mxu0 %vm3489_vm2, %v3118_v8  ;;  %v3354_v46 = vpop.eup %3353 }
0x11a2   :  { %v1724_v49 = vmul.f32 %v3354_v46, %v3346_v13 }
0x11bf   :  { %v1717_v6 = vpop.xlane.xlu1 %1716 }
0x11c0   :  { %3355 = vrcp.f32 %v1717_v6 }
0x11c3   :  { %v1813_v50 = vpop.permute.xlu1 %1812 }
0x11ca   :  { %v3356_v47 = vpop.eup %3355 }
0x11cb   :  { %v1723_v48 = vmul.f32 %v3356_v47, %v3348_v11 }
0x11cd   :  { %2950 = vmatprep.mubr.msk.f32.mxu0 %vm203_vm3, %v1723_v48 }
0x11ce   :  { %2951 = vmatmul.mubr.msk.f32.vlgmr.msra.gmra.mrb[14].mxu0 %vm203_vm3, %v1724_v49 }
0x11cf   :  { %3123 = vmatpush3.bf16.xpose.msk.msra.mxu0 %vm3489_vm2, %v3118_v8  ;;  %2957 = vmatprep.mubr.msk.f32.mxu0 %vm119_vm1, %v1813_v50 }
0x11d6   :  { %2958 = vmatmul.mubr.msk.f32.vlgmr.msra.gmra.mrb[16].mxu0 %vm119_vm1, %v1815_v2 }
0x126c   :  { %v3784_v18 = vpop.f32.mrb[12].mxu0 }
0x126d   :  { %v3786_v51 = vpop.f32.mrb[13].mxu0 }
0x12a1   :  { %v3788_v52 = vpop.f32.mrb[14].mxu0 }
0x12a2   :  { %v3790_v54 = vpop.f32.mrb[15].mxu0 }
0x12a9   :  { %v2959_v55 = vpop.f32.mrb[16].mxu0 }
0x12aa   :  { %v1900_v45 = vadd.f32 %v3381_v31, %v2959_v55  ;;  %v1894_v30 = vpop.f32.mrb[17].mxu0 }
0x12ab   :  { %v1895_v59 = vadd.f32 %v3382_v56, %v1894_v30 }
0x12ac   :  { %v1906_v60 = vsel %vm203_vm3, %v1900_v45, -inf }
0x12ad   :  { %1907 = vmax.xlane.f32.xlu0 %v1906_v60  ;;  %v1903_v61 = vsel %vm203_vm3, %v1895_v59, -inf }
0x12ae   :  { %1904 = vmax.xlane.f32.xlu1 %v1903_v61 }
0x133a   :  { %v1908_v62 = vpop.xlane.xlu0 %1907 }
0x133b   :  { %v1910_v4 = vsub.f32 %v1900_v45, %v1908_v62  ;;  %v1905_v7 = vpop.xlane.xlu1 %1904 }
0x133c   :  { %v1909_v9 = vsub.f32 %v1895_v59, %v1905_v7  ;;  %v3286_v7 = vpack.i.bf16 %v3694_v5, %v3689_v3 }
0x133d   :  { %v1913_v13 = vmul.f32 1.442695, %v1910_v4  ;;  %v3281_v4 = vpack.i.bf16 %v3682_v1, %v3677_v0 }
0x133e   :  { %v1911_v12 = vmul.f32 1.442695, %v1909_v9 }
0x133f   :  { %3357 = vpow2.f32 %v1913_v13 }
0x1340   :  { %3359 = vpow2.f32 %v1911_v12 }
0x1349   :  { %v3358_v20 = vpop.eup %3357 }
0x134a   :  { %v3360_v15 = vpop.eup %3359  ;;  %v1918_v11 = vsel %vm203_vm3, %v3358_v20, 0.0 }
0x134b   :  { %1919 = vadd.xlane.f32.xlu1 %v1918_v11  ;;  %v1915_v24 = vsel %vm203_vm3, %v3360_v15, 0.0 }
0x134c   :  { %1916 = vadd.xlane.f32.xlu0 %v1915_v24 }
0x135c   :  { %3272 = vrot.lane.b32.xlu1 %v3730_v42, %s3390_s9 }
0x1360   :  { %2012 = vrot.lane.b32.xlu1 %v3724_v43, %s3391_s10 }
0x1362   :  { %3267 = vrot.lane.b32.xlu0 %v3730_v42, %s3392_s11 }
0x1366   :  { %2014 = vrot.lane.b32.xlu0 %v3722_v21, %s3391_s10 }
0x13d8   :  { %v1920_v25 = vpop.xlane.xlu1 %1919 }
0x13d9   :  { %3361 = vrcp.f32 %v1920_v25  ;;  %v1917_v26 = vpop.xlane.xlu0 %1916 }
0x13da   :  { %3363 = vrcp.f32 %v1917_v26 }
0x13dc   :  { %v3273_v28 = vpop.permute.xlu1 %3272 }
0x13dd   :  { %v3268_v29 = vpop.permute.xlu0 %3267  ;;  %v3275_v32 = vunpack.i.h.bf16 %v3273_v28  ;;  %v3274_v33 = vunpack.i.l.bf16 %v3273_v28 }
0x13de   :  { %v3270_v34 = vunpack.i.h.bf16 %v3268_v29  ;;  %v3269_v35 = vunpack.i.l.bf16 %v3268_v29 }
0x13df   :  { %v3128_v37 = vpack.c.bf16 %v3275_v32, %v3274_v33 }
0x13e0   :  { %v3124_v36 = vpack.c.bf16 %v3270_v34, %v3269_v35  ;;  %v2013_v40 = vpop.permute.xlu1 %2012 }
0x13e1   :  { %v2015_v41 = vpop.permute.xlu0 %2014 }
0x13e2   :  { %3125 = vmatprep.subr.bf16.mxu1 %v3124_v36 }
0x13e3   :  { %v3362_v43 = vpop.eup %3361  ;;  %3127 = vmatpush3.bf16.msra.mxu1 %v3124_v36 }
0x13e4   :  { %v3364_v38 = vpop.eup %3363  ;;  %3130 = vmatprep.subr.msk.bf16.mxu1 %vm3489_vm2, %v3128_v37  ;;  %v1924_v39 = vmul.f32 %v3362_v43, %v3358_v20 }
0x13e5   :  { %v1923_v21 = vmul.f32 %v3364_v38, %v3360_v15 }
0x13e7   :  { %2964 = vmatprep.mubr.msk.f32.mxu1 %vm203_vm3, %v1923_v21 }
0x13e8   :  { %2965 = vmatmul.mubr.msk.f32.vlgmr.msra.gmra.mrb[18].mxu1 %vm203_vm3, %v1924_v39 }
0x13e9   :  { %2971 = vmatprep.mubr.msk.f32.mxu1 %vm119_vm1, %v2013_v40 }
0x13ec   :  { %3133 = vmatpush3.bf16.xpose.msk.msra.mxu1 %vm3489_vm2, %v3128_v37 }
0x13f3   :  { %2972 = vmatmul.mubr.msk.f32.vlgmr.msra.gmra.mrb[20].mxu1 %vm119_vm1, %v2015_v41 }
0x14bb   :  { %v2966_v8 = vpop.f32.mrb[18].mxu1 }
0x14bc   :  { %v2003_v6 = vpop.f32.mrb[19].mxu1 }
0x14c6   :  { %v2973_v46 = vpop.f32.mrb[20].mxu1 }
0x14c7   :  { %v2100_v47 = vadd.f32 %v3381_v31, %v2973_v46  ;;  %v2094_v48 = vpop.f32.mrb[21].mxu1 }
0x14c8   :  { %v2095_v49 = vadd.f32 %v3382_v56, %v2094_v48 }
0x14c9   :  { %v2106_v50 = vsel %vm203_vm3, %v2100_v47, -inf }
0x14ca   :  { %2107 = vmax.xlane.f32.xlu0 %v2106_v50  ;;  %v2103_v2 = vsel %vm203_vm3, %v2095_v49, -inf }
0x14cb   :  { %2104 = vmax.xlane.f32.xlu1 %v2103_v2 }
0x1557   :  { %v2108_v55 = vpop.xlane.xlu0 %2107 }
0x1558   :  { %v2110_v45 = vsub.f32 %v2100_v47, %v2108_v55  ;;  %v2105_v30 = vpop.xlane.xlu1 %2104 }
0x1559   :  { %v2109_v22 = vsub.f32 %v2095_v49, %v2105_v30 }
0x155a   :  { %v2113_v59 = vmul.f32 1.442695, %v2110_v45 }
0x155b   :  { %v2111_v60 = vmul.f32 1.442695, %v2109_v22 }
0x155c   :  { %3365 = vpow2.f32 %v2113_v59 }
0x155d   :  { %3367 = vpow2.f32 %v2111_v60 }
0x1566   :  { %v3366_v61 = vpop.eup %3365 }
0x1567   :  { %v3368_v62 = vpop.eup %3367  ;;  %v2118_v31 = vsel %vm203_vm3, %v3366_v61, 0.0 }
0x1568   :  { %2119 = vadd.xlane.f32.xlu1 %v2118_v31  ;;  %v2115_v56 = vsel %vm203_vm3, %v3368_v62, 0.0 }
0x1569   :  { %2116 = vadd.xlane.f32.xlu0 %v2115_v56  ;;  %v2660_v56 = vld [vmem:[%s3915_s2 + $0x68] sm:$0xff] }
0x1579   :  { %3282 = vrot.lane.b32.xlu1 %v3281_v4, %s3393_s12 }
0x157d   :  { %3287 = vrot.lane.b32.xlu1 %v3286_v7, %s3393_s12  ;;  %v2662_v7 = vld [vmem:[%s3915_s2 + $0x78] sm:$0xff] }
0x157f   :  { %3277 = vrot.lane.b32.xlu0 %v3730_v42, %s3394_s13 }
0x1581   :  { %2216 = vrot.lane.b32.xlu1 %v3788_v52, %s3395_s14 }
0x1583   :  { %2214 = vrot.lane.b32.xlu0 %v3790_v54, %s3395_s14 }
0x1585   :  { %2224 = vrot.lane.b32.xlu1 %v2966_v8, %s3396_s15 }
0x1587   :  { %2222 = vrot.lane.b32.xlu0 %v2003_v6, %s3396_s15 }
0x15f5   :  { %v2120_v0 = vpop.xlane.xlu1 %2119 }
0x15f6   :  { %3369 = vrcp.f32 %v2120_v0  ;;  %v2117_v1 = vpop.xlane.xlu0 %2116  ;;  %v2664_v0 = vld [vmem:[%s3915_s2 + $0x88] sm:$0xff] }
0x15f7   :  { %3371 = vrcp.f32 %v2117_v1  ;;  %v3150_v1 = vpack.c.bf16 %v2664_v0, %v2662_v7 }
0x15f9   :  { %v3283_v3 = vpop.permute.xlu1 %3282 }
0x15fa   :  { %v3285_v5 = vunpack.i.h.bf16 %v3283_v3  ;;  %v3284_v9 = vunpack.i.l.bf16 %v3283_v3  ;;  %v3278_v13 = vpop.permute.xlu0 %3277 }
0x15fb   :  { %v3280_v12 = vunpack.i.h.bf16 %v3278_v13  ;;  %v3279_v42 = vunpack.i.l.bf16 %v3278_v13 }
0x15fc   :  { %v3138_v20 = vpack.c.bf16 %v3285_v5, %v3284_v9  ;;  %v3296_v5 = vpack.i.bf16 %v2664_v0, %v2662_v7  ;;  %v2606_v0 = vrot.slane %v3717_v19, %v1309_v57 }
0x15fd   :  { %v3134_v15 = vpack.c.bf16 %v3280_v12, %v3279_v42  ;;  %v3288_v52 = vpop.permute.xlu1 %3287 }
0x15fe   :  { %v3290_v11 = vunpack.i.h.bf16 %v3288_v52  ;;  %v3289_v24 = vunpack.i.l.bf16 %v3288_v52  ;;  %v2215_v35 = vpop.permute.xlu0 %2214  ;;  %v2374_v52 = vrot.slane %v3717_v19, %v1076_v53 }
0x15ff   :  { %3135 = vmatprep.subr.bf16.mxu0 %v3134_v15  ;;  %v2236_v43 = vsel %vm119_vm1, %v3786_v51, %v2215_v35  ;;  %v2245_v51 = vrot.slane %v3717_v19, %v946_v23 }
0x1600   :  { %v3370_v54 = vpop.eup %3369  ;;  %3137 = vmatpush3.bf16.msra.mxu0 %v3134_v15  ;;  %v3142_v29 = vpack.c.bf16 %v3290_v11, %v3289_v24 }
0x1601   :  { %v3372_v25 = vpop.eup %3371  ;;  %3139 = vmatprep.subr.bf16.mxu0 %v3138_v20  ;;  %v2124_v28 = vmul.f32 %v3370_v54, %v3366_v61  ;;  %v2217_v34 = vpop.permute.xlu1 %2216 }
0x1602   :  { %v2123_v26 = vmul.f32 %v3372_v25, %v3368_v62  ;;  %v2223_v37 = vpop.permute.xlu0 %2222  ;;  %v2237_v21 = vsel %vm119_vm1, %v3784_v18, %v2217_v34 }
0x1603   :  { %v2238_v39 = vsel %vm203_vm3, %v2236_v43, %v2223_v37 }
0x1604   :  { %2978 = vmatprep.mubr.msk.f32.mxu0 %vm203_vm3, %v2123_v26 }
0x1605   :  { %2979 = vmatmul.mubr.msk.f32.vlgmr.msra.gmra.mrb[18].mxu0 %vm203_vm3, %v2124_v28  ;;  %v2225_v36 = vpop.permute.xlu1 %2224 }
0x1606   :  { %3141 = vmatpush3.bf16.msra.mxu0 %v3138_v20  ;;  %v2239_v41 = vsel %vm203_vm3, %v2237_v21, %v2225_v36 }
0x1607   :  { %3143 = vmatprep.subr.bf16.mxu0 %v3142_v29 }
0x160a   :  { %3145 = vmatpush3.bf16.msra.mxu0 %v3142_v29 }
0x16d8   :  { %v2980_v32 = vpop.f32.mrb[18].mxu0 }
0x16d9   :  { %2232 = vrot.lane.b32.xlu1 %v2980_v32, %s3397_s16  ;;  %v2203_v33 = vpop.f32.mrb[19].mxu0 }
0x16da   :  { %2230 = vrot.lane.b32.xlu0 %v2203_v33, %s3397_s16  ;;  %v2380_v33 = vrot.slane %v3717_v19, %v1082_v44  ;;  %v2386_v44 = vrot.slane %v3717_v19, %v1088_v17 }
0x174b   :  { %v2233_v38 = vpop.permute.xlu1 %2232 }
0x174c   :  { %v2231_v40 = vpop.permute.xlu0 %2230  ;;  %v2241_v6 = vsel %vm941_vm4, %v2239_v41, %v2233_v38 }
0x174d   :  { %v2240_v8 = vsel %vm941_vm4, %v2238_v39, %v2231_v40 }
0x174e   :  { %2989 = vmatprep.mubr.msk.f32.mxu0 %vm31_vm0, %v2240_v8 }
0x174f   :  { %2990 = vmatmul.mubr.msk.f32.vlgmr.msra.gmra.mrb[20].mxu0 %vm31_vm0, %v2241_v6 }
0x1822   :  { %v2991_v46 = vpop.f32.mrb[20].mxu0 }
0x1823   :  { %v2340_v47 = vadd.f32 %v2991_v46, %v2245_v51  ;;  %v2334_v18 = vpop.f32.mrb[21].mxu0  ;;  %v2473_v46 = vrot.slane %v3717_v19, %v1175_v27 }
0x1824   :  { %v2335_v48 = vadd.f32 %v2334_v18, %v2245_v51 }
0x1825   :  { %v2344_v49 = vadd.f32 %v2340_v47, %v3708_v16 }
0x1826   :  { %v2343_v50 = vadd.f32 %v2335_v48, %v3706_v14  ;;  %v2658_v14 = vld [vmem:[%s3915_s2 + $0x58] sm:$0xff] }
0x1827   :  { %v2348_v2 = vsel %vm31_vm0, %v2344_v49, 0.0  ;;  %v3146_v4 = vpack.c.bf16 %v2660_v56, %v2658_v14  ;;  %v3291_v3 = vpack.i.bf16 %v2660_v56, %v2658_v14 }
0x1828   :  { %2349 = vadd.xlane.f32.xlu1 %v2348_v2  ;;  %v2345_v55 = vsel %vm31_vm0, %v2343_v50, 0.0 }
0x1829   :  { %2346 = vadd.xlane.f32.xlu0 %v2345_v55  ;;  %3147 = vmatprep.subr.bf16.mxu1 %v3146_v4 }
0x182a   :  { %3149 = vmatpush3.bf16.msra.mxu1 %v3146_v4 }
0x182b   :  { %3151 = vmatprep.subr.bf16.mxu1 %v3150_v1 }
0x182e   :  { %3153 = vmatpush3.bf16.msra.mxu1 %v3150_v1 }
0x1839   :  { %3292 = vrot.lane.b32.xlu1 %v3291_v3, %s3386_s5 }
0x18b5   :  { %v2350_v45 = vpop.xlane.xlu1 %2349 }
0x18b6   :  { %v2352_v30 = vmul.f32 0.03125, %v2350_v45  ;;  %v2347_v22 = vpop.xlane.xlu0 %2346 }
0x18b7   :  { %v2351_v59 = vmul.f32 0.03125, %v2347_v22 }
0x18b8   :  { %v2354_v60 = vsub.f32 %v2344_v49, %v2352_v30 }
0x18b9   :  { %v2353_v23 = vsub.f32 %v2343_v50, %v2351_v59  ;;  %v3293_v11 = vpop.permute.xlu1 %3292 }
0x18ba   :  { %v2356_v31 = vmul.f32 %v2354_v60, %v2354_v60  ;;  %v3295_v25 = vunpack.i.h.bf16 %v3293_v11  ;;  %v3294_v26 = vunpack.i.l.bf16 %v3293_v11 }
0x18bb   :  { %v2355_v61 = vmul.f32 %v2353_v23, %v2353_v23 }
0x18bc   :  { %v2360_v16 = vsel %vm31_vm0, %v2356_v31, 0.0  ;;  %v3154_v34 = vpack.c.bf16 %v3295_v25, %v3294_v26 }
0x18bd   :  { %v2357_v62 = vsel %vm31_vm0, %v2355_v61, 0.0 }
0x18be   :  { %2358 = vadd.xlane.f32.xlu0 %v2357_v62  ;;  %3156 = vmatprep.subr.msk.bf16.mxu0 %vm3646_vm6, %v3154_v34 }
0x18bf   :  { %3159 = vmatpush3.bf16.xpose.msk.msra.mxu0 %vm3646_vm6, %v3154_v34 }
0x18c2   :  { %2361 = vadd.xlane.f32.xlu0 %v2360_v16 }
0x18d8   :  { %3297 = vrot.lane.b32.xlu0 %v3296_v5, %s3386_s5  ;;  %v2612_v5 = vrot.slane %v3717_v19, %v1315_v58 }
0x194b   :  { %v2359_v9 = vpop.xlane.xlu0 %2358 }
0x194c   :  { %v2363_v13 = vmul.f32 0.03125, %v2359_v9 }
0x194e   :  { %v2365_v12 = vadd.f32 1e-05, %v2363_v13 }
0x194f   :  { %v2362_v42 = vpop.xlane.xlu0 %2361 }
0x1950   :  { %3373 = vrsqrt.f32 %v2365_v12  ;;  %v2364_v20 = vmul.f32 0.03125, %v2362_v42 }
0x1952   :  { %v2366_v15 = vadd.f32 1e-05, %v2364_v20 }
0x1953   :  { %v3298_v24 = vpop.permute.xlu0 %3297 }
0x1954   :  { %3375 = vrsqrt.f32 %v2366_v15  ;;  %v3300_v28 = vunpack.i.h.bf16 %v3298_v24  ;;  %v3299_v29 = vunpack.i.l.bf16 %v3298_v24 }
0x1956   :  { %v3160_v35 = vpack.c.bf16 %v3300_v28, %v3299_v29 }
0x1958   :  { %3162 = vmatprep.subr.msk.bf16.mxu0 %vm3646_vm6, %v3160_v35 }
0x1959   :  { %3165 = vmatpush3.bf16.xpose.msk.msra.mxu0 %vm3646_vm6, %v3160_v35 }
0x195a   :  { %v3374_v54 = vpop.eup %3373 }
0x195b   :  { %v2369_v32 = vmul.f32 %v3374_v54, %v2353_v23 }
0x195d   :  { %v2375_v36 = vmul.f32 %v2374_v52, %v2369_v32 }
0x195e   :  { %v3376_v37 = vpop.eup %3375 }
0x195f   :  { %v2370_v53 = vmul.f32 %v3376_v37, %v2354_v60  ;;  %v2381_v43 = vadd.f32 %v2380_v33, %v2375_v36 }
0x1961   :  { %v2376_v38 = vmul.f32 %v2374_v52, %v2370_v53  ;;  %3000 = vmatprep.mubr.msk.f32.mxu1 %vm31_vm0, %v2381_v43 }
0x1963   :  { %v2382_v21 = vadd.f32 %v2380_v33, %v2376_v38 }
0x1965   :  { %3001 = vmatmul.mubr.msk.f32.vlgmr.msra.gmra.mrb[22].mxu1 %vm31_vm0, %v2382_v21 }
0x1a38   :  { %v3002_v39 = vpop.f32.mrb[22].mxu1 }
0x1a39   :  { %v2465_v40 = vadd.f32 %v3002_v39, %v2386_v44  ;;  %v2459_v41 = vpop.f32.mrb[23].mxu1 }
0x1a3a   :  { %v2460_v8 = vadd.f32 %v2459_v41, %v2386_v44 }
0x1a3b   :  { %v2469_v51 = vmax.f32 %v2465_v40, 0.0 }
0x1a3c   :  { %v2468_v6 = vmax.f32 %v2460_v8, 0.0 }
0x1a3e   :  { %3011 = vmatprep.mubr.msk.f32.mxu0 %vm1189_vm5, %v2468_v6 }
0x1a3f   :  { %3012 = vmatmul.mubr.msk.f32.vlgmr.msra.gmra.mrb[22].mxu0 %vm1189_vm5, %v2469_v51 }
0x1b12   :  { %v3013_v63 = vpop.f32.mrb[22].mxu0 }
0x1b13   :  { %v2572_v47 = vadd.f32 %v3013_v63, %v2473_v46  ;;  %v2566_v18 = vpop.f32.mrb[23].mxu0 }
0x1b14   :  { %v2567_v48 = vadd.f32 %v2566_v18, %v2473_v46 }
0x1b15   :  { %v2576_v49 = vadd.f32 %v2572_v47, %v2382_v21 }
0x1b16   :  { %v2575_v17 = vadd.f32 %v2567_v48, %v2381_v43 }
0x1b17   :  { %v2580_v50 = vsel %vm31_vm0, %v2576_v49, 0.0 }
0x1b18   :  { %2581 = vadd.xlane.f32.xlu0 %v2580_v50  ;;  %v2577_v2 = vsel %vm31_vm0, %v2575_v17, 0.0 }
0x1b19   :  { %2578 = vadd.xlane.f32.xlu1 %v2577_v2 }
0x1ba5   :  { %v2582_v55 = vpop.xlane.xlu0 %2581 }
0x1ba6   :  { %v2584_v45 = vmul.f32 0.03125, %v2582_v55  ;;  %v2579_v30 = vpop.xlane.xlu1 %2578 }
0x1ba7   :  { %v2583_v22 = vmul.f32 0.03125, %v2579_v30 }
0x1ba8   :  { %v2586_v59 = vsub.f32 %v2576_v49, %v2584_v45 }
0x1ba9   :  { %v2585_v60 = vsub.f32 %v2575_v17, %v2583_v22 }
0x1baa   :  { %v2588_v23 = vmul.f32 %v2586_v59, %v2586_v59 }
0x1bab   :  { %v2587_v27 = vmul.f32 %v2585_v60, %v2585_v60 }
0x1bac   :  { %v2592_v61 = vsel %vm31_vm0, %v2588_v23, 0.0 }
0x1bad   :  { %2593 = vadd.xlane.f32.xlu0 %v2592_v61  ;;  %v2589_v62 = vsel %vm31_vm0, %v2587_v27, 0.0 }
0x1bae   :  { %2590 = vadd.xlane.f32.xlu1 %v2589_v62 }
0x1c3a   :  { %v2594_v31 = vpop.xlane.xlu0 %2593 }
0x1c3b   :  { %v2596_v16 = vmul.f32 0.03125, %v2594_v31  ;;  %v2591_v14 = vpop.xlane.xlu1 %2590 }
0x1c3c   :  { %v2595_v56 = vmul.f32 0.03125, %v2591_v14 }
0x1c3d   :  { %v2598_v4 = vadd.f32 1e-05, %v2596_v16 }
0x1c3e   :  { %v2597_v7 = vadd.f32 1e-05, %v2595_v56 }
0x1c3f   :  { %3377 = vrsqrt.f32 %v2598_v4 }
0x1c40   :  { %3379 = vrsqrt.f32 %v2597_v7 }
0x1c49   :  { %v3378_v1 = vpop.eup %3377 }
0x1c4a   :  { %v3380_v3 = vpop.eup %3379  ;;  %v2602_v9 = vmul.f32 %v3378_v1, %v2586_v59 }
0x1c4b   :  { %v2601_v13 = vmul.f32 %v3380_v3, %v2585_v60 }
0x1c4c   :  { %v2608_v12 = vmul.f32 %v2606_v0, %v2602_v9 }
0x1c4d   :  { %v2607_v42 = vmul.f32 %v2606_v0, %v2601_v13 }
0x1c4e   :  { %v2614_v20 = vadd.f32 %v2612_v5, %v2608_v12 }
0x1c4f   :  { %v2613_v15 = vadd.f32 %v2612_v5, %v2607_v42 }
0x1c50   :  { %2616 = vst.msk [vmem:[%s3918_s3 + $0x8] sm:$0xff] %vm31_vm0, %v2614_v20 }
0x1c51   :  { %2615 = vst.msk [vmem:[%s3918_s3] sm:$0xff] %vm31_vm0, %v2613_v15 }

</bundles_post_ra>
